<compile_context>
chip_gen: v5e
topology: v5e:2x2
jax: 0.10.0
libtpu: 0.0.40
codegen_flags: <defaults>
</compile_context>

<pallas_src>
import functools

import jax
import jax.numpy as jnp
from jax.experimental import pallas as pl
from jax.experimental.pallas import tpu as pltpu

INPUT_SIZE = 51      # "whole pose" input as in the original model
K_PAD = 64           # first-layer K padded 51 -> 64 (zero pad, exact)
LINEAR_SIZE = 256
OUTPUT_SIZE = 1
NUM_STAGE = 3
BN_EPS = 1e-5
BATCH = 8

# Packed vector slab row layout (all rows length LINEAR_SIZE, f32):
#   row 0                         : folded bias+BN shift of w1
#   rows 1 .. 2*S                 : folded shifts of the two linears in each residual stage
#   rows 2*S+1 .. 4*S             : per-output-column dequant scales of those linears
#   row 4*S + 1                   : w2 weight as a row (head computed as VPU reduce)
#   row 4*S + 2                   : b2 broadcast (only element [., 0] is read)
SCALE0 = 1 + 2 * NUM_STAGE
W2_ROW = 1 + 4 * NUM_STAGE
B2_ROW = 2 + 4 * NUM_STAGE
N_VEC = 4 * NUM_STAGE + 3


# ------------------------------- kernel -------------------------------

def looking_kernel(x_ref, w1_ref, sw_ref, vec_ref, o_ref, *, wq):
    # ---- first layer: x (bf16, K padded to 64) @ W1' (bf16) + shift -> ReLU ----
    y = jnp.dot(x_ref[...], w1_ref[...], preferred_element_type=jnp.float32)
    y = jnp.maximum(y + vec_ref[0:1, :], 0.0)
    # TODO(synk): nn.Dropout is identity in eval mode; training-mode RNG masking not emitted.

    # ---- residual Linear blocks (num_stage = 3, unrolled) ----
    for i in range(NUM_STAGE):
        z = y
        for j in (2 * i, 2 * i + 1):
            w = sw_ref[j]
            if wq:
                # int8 / fp8 -> bf16 dequant on the VPU; the per-column scale is applied after
                # the f32 accumulate, so the MXU still sees a plain bf16 matmul.
                w = w.astype(jnp.float32).astype(jnp.bfloat16)
            z = jnp.dot(z.astype(jnp.bfloat16), w, preferred_element_type=jnp.float32)
            if wq:
                z = z * vec_ref[SCALE0 + j:SCALE0 + j + 1, :]
            z = jnp.maximum(z + vec_ref[1 + j:2 + j, :], 0.0)
        y = y + z                                   # residual add

    # ---- head: N=1 matmul replaced by VPU multiply + XLU cross-lane reduce + EUP sigmoid ----
    w2_row = vec_ref[W2_ROW:W2_ROW + 1, :]
    b2 = vec_ref[B2_ROW:B2_ROW + 1, 0:1]
    logits = jnp.sum(y * w2_row, axis=-1, keepdims=True) + b2
    o_ref[...] = jax.nn.sigmoid(logits)


# ------------------------------- wrapper -------------------------------

def _pick_tile(batch):
    """Batch tile: a single tile for small B; 256/512 for large B (fills the 256-row MXU on
    v6e/v7x and amortizes the ~0.35us per-grid-step overhead) while keeping >= 2 grid steps
    when B allows so "parallel" can shard the batch across v7x's two TensorCores."""
    b8 = ((batch + 7) // 8) * 8
    if b8 <= 256:
        return b8
    tm = 512
    if (b8 + tm - 1) // tm < 2:
        tm = 256
    return tm


def looking_model_forward(x, fp, *, tm=None):
    """fp = folded params from fold_params(); x is [B, INPUT_SIZE] float."""
    B = x.shape[0]
    TM = _pick_tile(B) if tm is None else tm
    Bp = ((B + TM - 1) // TM) * TM

    # bf16 activations; zero-pad batch -> Bp and features 51 -> 64 (w1 rows padded to match).
    xb = jnp.pad(x.astype(jnp.bfloat16), ((0, Bp - B), (0, K_PAD - INPUT_SIZE)))
    grid = (Bp // TM,)

    kernel = functools.partial(looking_kernel, wq=(fp["mode"] != "bf16"))
    out = pl.pallas_call(
        kernel,
        out_shape=jax.ShapeDtypeStruct((Bp, OUTPUT_SIZE), jnp.float32),
        grid_spec=pltpu.PrefetchScalarGridSpec(
            num_scalar_prefetch=0,
            grid=grid,
            in_specs=[
                # activations: one batch tile per grid step
                pl.BlockSpec((TM, K_PAD), lambda i: (i, 0)),
                # weights / vec slab: constant index_map -> resident in VMEM across the batch
                pl.BlockSpec((K_PAD, LINEAR_SIZE), lambda i: (0, 0)),
                pl.BlockSpec((2 * NUM_STAGE, LINEAR_SIZE, LINEAR_SIZE),
                             lambda i: (0, 0, 0)),
                pl.BlockSpec((N_VEC, LINEAR_SIZE), lambda i: (0, 0)),
            ],
            out_specs=pl.BlockSpec((TM, OUTPUT_SIZE), lambda i: (i, 0)),
        ),
        compiler_params=pltpu.CompilerParams(
            dimension_semantics=("parallel",)),
    )(xb, fp["w1"], fp["sw"], fp["vec"])
    return out[:B]


# ------------------------- host-side parameter glue -------------------------

def _key_iter(key):
    while True:
        key, sub = jax.random.split(key)
        yield sub


def make_raw_params(key):
    """Deterministic synthetic parameters matching the PyTorch module shapes.
    Linear weights are stored pre-transposed as [in, out] for x @ W."""
    k = _key_iter(key)

    def lin(fan_in, fan_out):
        w = jax.random.normal(next(k), (fan_in, fan_out), jnp.float32) * 0.05
        b = jax.random.normal(next(k), (fan_out,), jnp.float32) * 0.05
        return w, b

    def bn(dim):
        gamma = 1.0 + 0.1 * jax.random.normal(next(k), (dim,), jnp.float32)
        beta = 0.1 * jax.random.normal(next(k), (dim,), jnp.float32)
        mean = 0.1 * jax.random.normal(next(k), (dim,), jnp.float32)
        var = 1.0 + 0.1 * jnp.abs(jax.random.normal(next(k), (dim,), jnp.float32))
        return dict(gamma=gamma, beta=beta, mean=mean, var=var)

    raw = {}
    raw["w1"], raw["b1"] = lin(INPUT_SIZE, LINEAR_SIZE)
    raw["bn1"] = bn(LINEAR_SIZE)
    raw["stages"] = []
    for _ in range(NUM_STAGE):
        w_l1, b_l1 = lin(LINEAR_SIZE, LINEAR_SIZE)
        bn_1 = bn(LINEAR_SIZE)
        w_l2, b_l2 = lin(LINEAR_SIZE, LINEAR_SIZE)
        bn_2 = bn(LINEAR_SIZE)
        raw["stages"].append(dict(w_l1=w_l1, b_l1=b_l1, bn1=bn_1,
                                  w_l2=w_l2, b_l2=b_l2, bn2=bn_2))
    raw["w2"], raw["b2"] = lin(LINEAR_SIZE, OUTPUT_SIZE)
    return raw


def _bn_scale_shift(bn, eps=BN_EPS):
    scale = bn["gamma"] / jnp.sqrt(bn["var"] + eps)
    shift = bn["beta"] - bn["mean"] * scale
    return scale, shift


def _weight_mode():
    """Chip-gated weight compression: int8 on v5e/v6e, fp8 on v7x, bf16 elsewhere."""
    try:
        kind = jax.devices()[0].device_kind.lower()
    except Exception:
        return "bf16"
    if "v7" in kind or "tpu7" in kind:
        return "fp8" if hasattr(jnp, "float8_e4m3fn") else "bf16"
    if "v5" in kind or "v6" in kind:
        return "int8"
    return "bf16"   # v2/v3/v4 or unknown: keep the safe bf16 MXU path


def _quantize_per_col(w, mode):
    """Per-output-column weight quantization; returns (q_weights, f32 dequant-scale row)."""
    if mode == "bf16":
        return w.astype(jnp.bfloat16), jnp.ones((w.shape[1],), jnp.float32)
    col_max = jnp.maximum(jnp.max(jnp.abs(w), axis=0), 1e-12)
    if mode == "int8":
        scale = col_max / 127.0
        q = jnp.clip(jnp.round(w / scale), -127.0, 127.0).astype(jnp.int8)
        return q, scale.astype(jnp.float32)
    if mode == "fp8":
        scale = col_max                       # map column max to 1.0 (well inside e4m3 range)
        q = (w / scale).astype(jnp.float8_e4m3fn)
        return q, scale.astype(jnp.float32)
    raise ValueError(f"unknown weight mode {mode!r}")


def fold_params(raw, mode=None):
    """Fold Linear bias + eval-mode BatchNorm1d into the weights, quantize the six big stage
    matrices per output column, and pack every small vector into ONE f32 slab (single DMA)."""
    if mode is None:
        mode = _weight_mode()

    def fold(w, b, bn):
        scale, shift = _bn_scale_shift(bn)
        return w * scale[None, :], b * scale + shift

    # First layer: tiny (64x256) -> keep bf16; pad rows 51 -> 64 to match the padded input.
    w1f, shift1 = fold(raw["w1"], raw["b1"], raw["bn1"])
    w1f = jnp.pad(w1f, ((0, K_PAD - INPUT_SIZE), (0, 0))).astype(jnp.bfloat16)

    sw_q, scales, shifts = [], [], [shift1]
    for st in raw["stages"]:
        for (w, b, bn) in ((st["w_l1"], st["b_l1"], st["bn1"]),
                           (st["w_l2"], st["b_l2"], st["bn2"])):
            wf, sf = fold(w, b, bn)
            q, qs = _quantize_per_col(wf, mode)
            sw_q.append(q)
            scales.append(qs)
            shifts.append(sf)

    w2_row = raw["w2"][:, 0]                                   # (LINEAR_SIZE,)
    b2_row = jnp.full((LINEAR_SIZE,), raw["b2"][0], jnp.float32)

    vec = jnp.stack(shifts + scales + [w2_row, b2_row]).astype(jnp.float32)  # (15, 256)
    return {
        "mode": mode,
        "w1": w1f,                      # (64, 256)  bf16
        "sw": jnp.stack(sw_q),          # (6, 256, 256)  int8 / fp8 / bf16
        "vec": vec,                     # (15, 256)  f32
    }


def reference_forward(x, raw):
    """Pure-JAX f32 reference of the eval-mode forward (un-folded, un-quantized params)."""
    def bn_apply(h, bn):
        scale, shift = _bn_scale_shift(bn)
        return h * scale + shift

    y = jnp.maximum(bn_apply(x @ raw["w1"] + raw["b1"], raw["bn1"]), 0.0)
    for st in raw["stages"]:
        z = jnp.maximum(bn_apply(y @ st["w_l1"] + st["b_l1"], st["bn1"]), 0.0)
        z = jnp.maximum(bn_apply(z @ st["w_l2"] + st["b_l2"], st["bn2"]), 0.0)
        y = y + z
    return jax.nn.sigmoid(y @ raw["w2"] + raw["b2"])


if __name__ == "__main__":
    key = jax.random.PRNGKey(0)
    kx, kp = jax.random.split(key)
    x = jax.random.normal(kx, (BATCH, INPUT_SIZE), jnp.float32)

    raw = make_raw_params(kp)
    fp = fold_params(raw)

    out = jax.block_until_ready(looking_model_forward(x, fp))
    ref = reference_forward(x, raw)
    assert out.shape == (BATCH, OUTPUT_SIZE)

    # Tolerance vs the f32 reference depends on the chip-gated weight compression.
    tol = {"bf16": 2e-2, "int8": 3e-2, "fp8": 7e-2}[fp["mode"]]
    err = float(jnp.max(jnp.abs(out - ref)))
    assert err < tol, (
        f"mismatch vs JAX reference (mode={fp['mode']}): max abs diff {err}")
    print("KERNEL_OK")
</pallas_src>

<mosaic_0001>
module attributes {stable_mosaic.version = 11 : i64} {
  func.func @looking_kernel(%arg0: i32, %arg1: memref<8x64xbf16, #tpu.memory_space<vmem>>, %arg2: memref<64x256xbf16, #tpu.memory_space<vmem>>, %arg3: memref<6x256x256xbf16, #tpu.memory_space<vmem>>, %arg4: memref<15x256xf32, #tpu.memory_space<vmem>>, %arg5: memref<8x1xf32, #tpu.memory_space<vmem>>) attributes {dimension_semantics = [#tpu.dimension_semantics<parallel>], iteration_bounds = array<i64: 1>, scalar_prefetch = 0 : i64, scratch_operands = 0 : i64, tpu.core_type = #tpu.core_type<tc>, window_params = [{transform_indices = @transform_0, window_bounds = array<i64: 8, 64>}, {pipeline_mode = #tpu.pipeline_mode<synchronous>, transform_indices = @transform_1, window_bounds = array<i64: 64, 256>}, {pipeline_mode = #tpu.pipeline_mode<synchronous>, transform_indices = @transform_2, window_bounds = array<i64: 6, 256, 256>}, {pipeline_mode = #tpu.pipeline_mode<synchronous>, transform_indices = @transform_3, window_bounds = array<i64: 15, 256>}, {transform_indices = @transform_4, window_bounds = array<i64: 8, 1>}]} {
    %c0 = arith.constant 0 : index
    %c0_0 = arith.constant 0 : index
    %0 = vector.load %arg1[%c0, %c0_0] : memref<8x64xbf16, #tpu.memory_space<vmem>>, vector<8x64xbf16>
    %c0_1 = arith.constant 0 : index
    %c0_2 = arith.constant 0 : index
    %1 = vector.load %arg2[%c0_1, %c0_2] : memref<64x256xbf16, #tpu.memory_space<vmem>>, vector<64x256xbf16>
    %cst = arith.constant dense<0.000000e+00> : vector<8x256xf32>
    %2 = tpu.matmul %0, %1, %cst {dimension_numbers = #tpu.dot_dimension_numbers<[1], [0], [0], [1], [0, 0, 1, 1], [], []>} : vector<8x64xbf16>, vector<64x256xbf16>, vector<8x256xf32> -> vector<8x256xf32>
    %c0_3 = arith.constant 0 : index
    %c0_4 = arith.constant 0 : index
    %3 = vector.load %arg4[%c0_3, %c0_4] : memref<15x256xf32, #tpu.memory_space<vmem>>, vector<1x256xf32>
    %4 = vector.broadcast %3 : vector<1x256xf32> to vector<8x256xf32>
    %5 = arith.addf %2, %4 : vector<8x256xf32>
    %cst_5 = arith.constant 0.000000e+00 : f32
    %6 = vector.broadcast %cst_5 : f32 to vector<8x256xf32>
    %7 = arith.maximumf %5, %6 : vector<8x256xf32>
    %c0_6 = arith.constant 0 : index
    %c0_7 = arith.constant 0 : index
    %c0_8 = arith.constant 0 : index
    %8 = vector.load %arg3[%c0_6, %c0_7, %c0_8] : memref<6x256x256xbf16, #tpu.memory_space<vmem>>, vector<1x256x256xbf16>
    %9 = vector.shape_cast %8 : vector<1x256x256xbf16> to vector<256x256xbf16>
    %10 = arith.truncf %7 : vector<8x256xf32> to vector<8x256xbf16>
    %cst_9 = arith.constant dense<0.000000e+00> : vector<8x256xf32>
    %11 = tpu.matmul %10, %9, %cst_9 {dimension_numbers = #tpu.dot_dimension_numbers<[1], [0], [0], [1], [0, 0, 1, 1], [], []>} : vector<8x256xbf16>, vector<256x256xbf16>, vector<8x256xf32> -> vector<8x256xf32>
    %c1 = arith.constant 1 : index
    %c0_10 = arith.constant 0 : index
    %12 = vector.load %arg4[%c1, %c0_10] : memref<15x256xf32, #tpu.memory_space<vmem>>, vector<1x256xf32>
    %13 = vector.broadcast %12 : vector<1x256xf32> to vector<8x256xf32>
    %14 = arith.addf %11, %13 : vector<8x256xf32>
    %cst_11 = arith.constant 0.000000e+00 : f32
    %15 = vector.broadcast %cst_11 : f32 to vector<8x256xf32>
    %16 = arith.maximumf %14, %15 : vector<8x256xf32>
    %c1_12 = arith.constant 1 : index
    %c0_13 = arith.constant 0 : index
    %c0_14 = arith.constant 0 : index
    %17 = vector.load %arg3[%c1_12, %c0_13, %c0_14] : memref<6x256x256xbf16, #tpu.memory_space<vmem>>, vector<1x256x256xbf16>
    %18 = vector.shape_cast %17 : vector<1x256x256xbf16> to vector<256x256xbf16>
    %19 = arith.truncf %16 : vector<8x256xf32> to vector<8x256xbf16>
    %cst_15 = arith.constant dense<0.000000e+00> : vector<8x256xf32>
    %20 = tpu.matmul %19, %18, %cst_15 {dimension_numbers = #tpu.dot_dimension_numbers<[1], [0], [0], [1], [0, 0, 1, 1], [], []>} : vector<8x256xbf16>, vector<256x256xbf16>, vector<8x256xf32> -> vector<8x256xf32>
    %c2 = arith.constant 2 : index
    %c0_16 = arith.constant 0 : index
    %21 = vector.load %arg4[%c2, %c0_16] : memref<15x256xf32, #tpu.memory_space<vmem>>, vector<1x256xf32>
    %22 = vector.broadcast %21 : vector<1x256xf32> to vector<8x256xf32>
    %23 = arith.addf %20, %22 : vector<8x256xf32>
    %cst_17 = arith.constant 0.000000e+00 : f32
    %24 = vector.broadcast %cst_17 : f32 to vector<8x256xf32>
    %25 = arith.maximumf %23, %24 : vector<8x256xf32>
    %26 = arith.addf %7, %25 : vector<8x256xf32>
    %c2_18 = arith.constant 2 : index
    %c0_19 = arith.constant 0 : index
    %c0_20 = arith.constant 0 : index
    %27 = vector.load %arg3[%c2_18, %c0_19, %c0_20] : memref<6x256x256xbf16, #tpu.memory_space<vmem>>, vector<1x256x256xbf16>
    %28 = vector.shape_cast %27 : vector<1x256x256xbf16> to vector<256x256xbf16>
    %29 = arith.truncf %26 : vector<8x256xf32> to vector<8x256xbf16>
    %cst_21 = arith.constant dense<0.000000e+00> : vector<8x256xf32>
    %30 = tpu.matmul %29, %28, %cst_21 {dimension_numbers = #tpu.dot_dimension_numbers<[1], [0], [0], [1], [0, 0, 1, 1], [], []>} : vector<8x256xbf16>, vector<256x256xbf16>, vector<8x256xf32> -> vector<8x256xf32>
    %c3 = arith.constant 3 : index
    %c0_22 = arith.constant 0 : index
    %31 = vector.load %arg4[%c3, %c0_22] : memref<15x256xf32, #tpu.memory_space<vmem>>, vector<1x256xf32>
    %32 = vector.broadcast %31 : vector<1x256xf32> to vector<8x256xf32>
    %33 = arith.addf %30, %32 : vector<8x256xf32>
    %cst_23 = arith.constant 0.000000e+00 : f32
    %34 = vector.broadcast %cst_23 : f32 to vector<8x256xf32>
    %35 = arith.maximumf %33, %34 : vector<8x256xf32>
    %c3_24 = arith.constant 3 : index
    %c0_25 = arith.constant 0 : index
    %c0_26 = arith.constant 0 : index
    %36 = vector.load %arg3[%c3_24, %c0_25, %c0_26] : memref<6x256x256xbf16, #tpu.memory_space<vmem>>, vector<1x256x256xbf16>
    %37 = vector.shape_cast %36 : vector<1x256x256xbf16> to vector<256x256xbf16>
    %38 = arith.truncf %35 : vector<8x256xf32> to vector<8x256xbf16>
    %cst_27 = arith.constant dense<0.000000e+00> : vector<8x256xf32>
    %39 = tpu.matmul %38, %37, %cst_27 {dimension_numbers = #tpu.dot_dimension_numbers<[1], [0], [0], [1], [0, 0, 1, 1], [], []>} : vector<8x256xbf16>, vector<256x256xbf16>, vector<8x256xf32> -> vector<8x256xf32>
    %c4 = arith.constant 4 : index
    %c0_28 = arith.constant 0 : index
    %40 = vector.load %arg4[%c4, %c0_28] : memref<15x256xf32, #tpu.memory_space<vmem>>, vector<1x256xf32>
    %41 = vector.broadcast %40 : vector<1x256xf32> to vector<8x256xf32>
    %42 = arith.addf %39, %41 : vector<8x256xf32>
    %cst_29 = arith.constant 0.000000e+00 : f32
    %43 = vector.broadcast %cst_29 : f32 to vector<8x256xf32>
    %44 = arith.maximumf %42, %43 : vector<8x256xf32>
    %45 = arith.addf %26, %44 : vector<8x256xf32>
    %c4_30 = arith.constant 4 : index
    %c0_31 = arith.constant 0 : index
    %c0_32 = arith.constant 0 : index
    %46 = vector.load %arg3[%c4_30, %c0_31, %c0_32] : memref<6x256x256xbf16, #tpu.memory_space<vmem>>, vector<1x256x256xbf16>
    %47 = vector.shape_cast %46 : vector<1x256x256xbf16> to vector<256x256xbf16>
    %48 = arith.truncf %45 : vector<8x256xf32> to vector<8x256xbf16>
    %cst_33 = arith.constant dense<0.000000e+00> : vector<8x256xf32>
    %49 = tpu.matmul %48, %47, %cst_33 {dimension_numbers = #tpu.dot_dimension_numbers<[1], [0], [0], [1], [0, 0, 1, 1], [], []>} : vector<8x256xbf16>, vector<256x256xbf16>, vector<8x256xf32> -> vector<8x256xf32>
    %c5 = arith.constant 5 : index
    %c0_34 = arith.constant 0 : index
    %50 = vector.load %arg4[%c5, %c0_34] : memref<15x256xf32, #tpu.memory_space<vmem>>, vector<1x256xf32>
    %51 = vector.broadcast %50 : vector<1x256xf32> to vector<8x256xf32>
    %52 = arith.addf %49, %51 : vector<8x256xf32>
    %cst_35 = arith.constant 0.000000e+00 : f32
    %53 = vector.broadcast %cst_35 : f32 to vector<8x256xf32>
    %54 = arith.maximumf %52, %53 : vector<8x256xf32>
    %c5_36 = arith.constant 5 : index
    %c0_37 = arith.constant 0 : index
    %c0_38 = arith.constant 0 : index
    %55 = vector.load %arg3[%c5_36, %c0_37, %c0_38] : memref<6x256x256xbf16, #tpu.memory_space<vmem>>, vector<1x256x256xbf16>
    %56 = vector.shape_cast %55 : vector<1x256x256xbf16> to vector<256x256xbf16>
    %57 = arith.truncf %54 : vector<8x256xf32> to vector<8x256xbf16>
    %cst_39 = arith.constant dense<0.000000e+00> : vector<8x256xf32>
    %58 = tpu.matmul %57, %56, %cst_39 {dimension_numbers = #tpu.dot_dimension_numbers<[1], [0], [0], [1], [0, 0, 1, 1], [], []>} : vector<8x256xbf16>, vector<256x256xbf16>, vector<8x256xf32> -> vector<8x256xf32>
    %c6 = arith.constant 6 : index
    %c0_40 = arith.constant 0 : index
    %59 = vector.load %arg4[%c6, %c0_40] : memref<15x256xf32, #tpu.memory_space<vmem>>, vector<1x256xf32>
    %60 = vector.broadcast %59 : vector<1x256xf32> to vector<8x256xf32>
    %61 = arith.addf %58, %60 : vector<8x256xf32>
    %cst_41 = arith.constant 0.000000e+00 : f32
    %62 = vector.broadcast %cst_41 : f32 to vector<8x256xf32>
    %63 = arith.maximumf %61, %62 : vector<8x256xf32>
    %64 = arith.addf %45, %63 : vector<8x256xf32>
    %c13 = arith.constant 13 : index
    %c0_42 = arith.constant 0 : index
    %65 = vector.load %arg4[%c13, %c0_42] : memref<15x256xf32, #tpu.memory_space<vmem>>, vector<1x256xf32>
    %c14 = arith.constant 14 : index
    %c0_43 = arith.constant 0 : index
    %66 = vector.load %arg4[%c14, %c0_43] : memref<15x256xf32, #tpu.memory_space<vmem>>, vector<1x1xf32>
    %67 = vector.broadcast %65 : vector<1x256xf32> to vector<8x256xf32>
    %68 = arith.mulf %64, %67 : vector<8x256xf32>
    %cst_44 = arith.constant dense<0.000000e+00> : vector<8xf32>
    %69 = vector.multi_reduction <add>, %68, %cst_44 [1] : vector<8x256xf32> to vector<8xf32>
    %70 = vector.shape_cast %69 : vector<8xf32> to vector<8x1xf32>
    %71 = vector.broadcast %66 : vector<1x1xf32> to vector<8x1xf32>
    %72 = arith.addf %70, %71 : vector<8x1xf32>
    %73 = arith.negf %72 : vector<8x1xf32>
    %74 = math.exp %73 : vector<8x1xf32>
    %cst_45 = arith.constant 1.000000e+00 : f32
    %75 = vector.broadcast %cst_45 : f32 to vector<8x1xf32>
    %76 = arith.addf %75, %74 : vector<8x1xf32>
    %77 = arith.divf %75, %76 : vector<8x1xf32>
    %c0_46 = arith.constant 0 : index
    %c0_47 = arith.constant 0 : index
    %78 = vector.load %arg5[%c0_46, %c0_47] : memref<8x1xf32, #tpu.memory_space<vmem>>, vector<8x1xf32>
    tpu.vector_store %arg5[%c0_46, %c0_47], %77 {strides = array<i32>} : memref<8x1xf32, #tpu.memory_space<vmem>>, vector<8x1xf32>,
    return
  }
  func.func @transform_0(%arg0: i32) -> (i32, i32) {
    %c0_i32 = arith.constant 0 : i32
    %c0_i32_0 = arith.constant 0 : i32
    return %arg0, %c0_i32 : i32, i32
  }
  func.func @transform_1(%arg0: i32) -> (i32, i32) {
    %c0_i32 = arith.constant 0 : i32
    %c0_i32_0 = arith.constant 0 : i32
    %c0_i32_1 = arith.constant 0 : i32
    return %c0_i32, %c0_i32_0 : i32, i32
  }
  func.func @transform_2(%arg0: i32) -> (i32, i32, i32) {
    %c0_i32 = arith.constant 0 : i32
    %c0_i32_0 = arith.constant 0 : i32
    %c0_i32_1 = arith.constant 0 : i32
    %c0_i32_2 = arith.constant 0 : i32
    return %c0_i32, %c0_i32_0, %c0_i32_1 : i32, i32, i32
  }
  func.func @transform_3(%arg0: i32) -> (i32, i32) {
    %c0_i32 = arith.constant 0 : i32
    %c0_i32_0 = arith.constant 0 : i32
    %c0_i32_1 = arith.constant 0 : i32
    return %c0_i32, %c0_i32_0 : i32, i32
  }
  func.func @transform_4(%arg0: i32) -> (i32, i32) {
    %c0_i32 = arith.constant 0 : i32
    %c0_i32_0 = arith.constant 0 : i32
    return %arg0, %c0_i32 : i32, i32
  }
}

</mosaic_0001>

<bundles_post_ra>
// kernel: tpu_custom_call.1
= control target key start
LH: loop header
LB: loop body
LE: loop exit
PB: predicated region body
PF: predicated region fallthrough
CT: control target
= control target key end

     0   :  { %9 = vsyncpa [#allocation3], 0  ;;  %s2946_s0 = inlined_call_operand.hbm [shape: bf16[8,64], index: 0, kind: input, shape index: {}]   ;;  %s2947_s1 = inlined_call_operand.hbm [shape: bf16[64,256], index: 1, kind: input, shape index: {}]   ;;  %s2948_s2 = inlined_call_operand.hbm [shape: bf16[6,256,256], index: 2, kind: input, shape index: {}]   ;;  %s2949_s3 = inlined_call_operand.hbm [shape: f32[15,256], index: 3, kind: input, shape index: {}]   ;;  %s2950_s4 = inlined_call_operand.vmem [shape: f32[8,1], index: 4, kind: output, shape index: {}]  }
   0x1   :  { %10 = vsyncpa [#allocation5], 0  ;;  %s27_s17 = sshll.u32 %s2947_s1, 4  ;;  %s28_s17 = int_to_ptr.hbm [resolvable:$true] %s27_s17 }
   0x2   :  { %11 = vsyncpa [#allocation8], 0  ;;  %s2866_s18 = smov [#allocation4]   ;;  %s17_s22 = sshll.u32 %s2946_s0, 4  ;;  %s18_s22 = int_to_ptr.hbm [resolvable:$true] %s17_s22 }
   0x3   :  { %s29_s19 = sshll.u32 %s2866_s18, 4  ;;  %s2867_s23 = smov 128   ;;  %s30_s19 = int_to_ptr.vmem [resolvable:$true] %s29_s19 }
   0x4   :  { %s2868_s24 = smov 8   ;;  %s2869_s25 = smov [#allocation2]  }
   0x5   :  { %35 = dma.hbm_to_vmem [thread:$0]  %s28_s17, 1024, %s30_s19, [#allocation5], %s2867_s23, %s2867_s23, %s2868_s24  }
   0x6   :  { %s19_s26 = sshll.u32 %s2869_s25, 4  ;;  %s40_s29 = sshll.u32 %s2948_s2, 4  ;;  %s20_s26 = int_to_ptr.vmem [resolvable:$true] %s19_s26  ;;  %s41_s29 = int_to_ptr.hbm [resolvable:$true] %s40_s29 }
   0x7   :  { %22 = dma.hbm_to_vmem [thread:$0]  %s18_s22, 64, %s20_s26, [#allocation3]  }
   0x8   :  { %s53_s5 = sshll.u32 %s2949_s3, 4  ;;  %s2870_s6 = smov [#allocation6]   ;;  %s54_s5 = int_to_ptr.hbm [resolvable:$true] %s53_s5 }
   0x9   :  { %s42_s7 = sshll.u32 %s2870_s6, 4  ;;  %s2871_s0 = smov [#allocation7]   ;;  %s43_s7 = int_to_ptr.vmem [resolvable:$true] %s42_s7 }
   0xa   :  { %48 = dma.hbm_to_vmem [thread:$0]  %s41_s29, 24576, %s43_s7, [#allocation5], %s2867_s23, %s2867_s23, %s2868_s24  }
   0xb   :  { %s55_s8 = sshll.u32 %s2871_s0, 4  ;;  %s2872_s9 = smov 256   ;;  %s56_s8 = int_to_ptr.vmem [resolvable:$true] %s55_s8 }
   0xc   :  { %s2873_s10 = smov 16  }
   0xd   :  { %61 = dma.hbm_to_vmem [thread:$0]  %s54_s5, 512, %s56_s8, [#allocation8], %s2872_s9, %s2872_s9, %s2873_s10  }
   0xe   :  { %2860 = dma.done.wait [#allocation3], 64  }
   0xf   :  { %2861 = vsyncadd [#allocation3], 4294967232 }
  0x10   :  { %2862 = dma.done.wait [#allocation5], 25600  }
  0x11   :  { %2863 = vsyncadd [#allocation5], 4294941696 }
  0x12   :  { %2864 = dma.done.wait [#allocation8], 512  }
  0x13   :  { %2865 = vsyncadd [#allocation8], 4294966784  ;;  %v1775_v0 = vld [vmem:[#allocation4 + $0x30] sm:$0xf]  ;;  %v2559_v1 = vld [vmem:[#allocation4 + $0x34] sm:$0xf0] }
  0x14   :  { %v2558_v2 = vld [vmem:[#allocation4 + $0x34] sm:$0xf]  ;;  %v1776_v3 = vor.u32 %v2559_v1, %v1775_v0  ;;  %v1777_v4 = vld [vmem:[#allocation4 + $0x38] sm:$0xf0]  ;;  %v1767_v5 = vld [vmem:[#allocation4 + $0x20] sm:$0xf] }
  0x15   :  { %v2557_v6 = vld [vmem:[#allocation4 + $0x24] sm:$0xf0]  ;;  %v1780_v7 = vor.u32 %v2558_v2, %v1777_v4  ;;  %v2556_v8 = vld [vmem:[#allocation4 + $0x24] sm:$0xf]  ;;  %v1769_v9 = vld [vmem:[#allocation4 + $0x28] sm:$0xf0] }
  0x16   :  { %142 = vmatpush.bf16.msra.mxu0 %v1776_v3  ;;  %v1768_v10 = vor.u32 %v2557_v6, %v1767_v5  ;;  %v1772_v11 = vor.u32 %v2556_v8, %v1769_v9  ;;  %v1759_v12 = vld [vmem:[#allocation4 + $0x10] sm:$0xf]  ;;  %v2555_v13 = vld [vmem:[#allocation4 + $0x14] sm:$0xf0]  ;;  %v2554_v14 = vld [vmem:[#allocation4 + $0x14] sm:$0xf] }
  0x17   :  { %155 = vmatpush.bf16.msra.mxu1 %v1780_v7  ;;  %v1761_v15 = vld [vmem:[#allocation4 + $0x18] sm:$0xf0]  ;;  %v1841_v16 = vld [vmem:[#allocation6 + $0x70] sm:$0xf]  ;;  %v1751_v17 = vld [vmem:[#allocation4] sm:$0xf]  ;;  %v1760_v21 = vor.u32 %v2555_v13, %v1759_v12 }
  0x18   :  { %v2575_v18 = vld [vmem:[#allocation6 + $0x74] sm:$0xf0]  ;;  %v1905_v19 = vld [vmem:[#allocation6 + $0xf0] sm:$0xf]  ;;  %v2553_v22 = vld [vmem:[#allocation4 + $0x4] sm:$0xf0]  ;;  %v1764_v27 = vor.u32 %v2554_v14, %v1761_v15 }
  0x19   :  { %v2591_v20 = vld [vmem:[#allocation6 + $0xf4] sm:$0xf0]  ;;  %v2552_v23 = vld [vmem:[#allocation4 + $0x4] sm:$0xf]  ;;  %v1753_v24 = vld [vmem:[#allocation4 + $0x8] sm:$0xf0]  ;;  %v1842_v25 = vor.u32 %v2575_v18, %v1841_v16  ;;  %v1752_v38 = vor.u32 %v2553_v22, %v1751_v17 }
  0x1a   :  { %143 = vmatpush.bf16.msra.mxu0 %v1768_v10  ;;  %v1906_v26 = vor.u32 %v2591_v20, %v1905_v19  ;;  %v2574_v28 = vld [vmem:[#allocation6 + $0x74] sm:$0xf]  ;;  %v1833_v29 = vld [vmem:[#allocation6 + $0x60] sm:$0xf]  ;;  %v2573_v30 = vld [vmem:[#allocation6 + $0x64] sm:$0xf0]  ;;  %v1756_v42 = vor.u32 %v2552_v23, %v1753_v24 }
  0x1b   :  { %156 = vmatpush.bf16.msra.mxu1 %v1772_v11  ;;  %367 = vmatpush.bf16.msra.mxu2 %v1842_v25  ;;  %v1843_v31 = vld [vmem:[#allocation6 + $0x78] sm:$0xf0]  ;;  %v1834_v32 = vor.u32 %v2573_v30, %v1833_v29  ;;  %v1897_v33 = vld [vmem:[#allocation6 + $0xe0] sm:$0xf]  ;;  %v2589_v34 = vld [vmem:[#allocation6 + $0xe4] sm:$0xf0] }
  0x1c   :  { %380 = vmatpush.bf16.msra.mxu3 %v1906_v26  ;;  %v2590_v35 = vld [vmem:[#allocation6 + $0xf4] sm:$0xf]  ;;  %v1907_v36 = vld [vmem:[#allocation6 + $0xf8] sm:$0xf0]  ;;  %v1898_v37 = vor.u32 %v2589_v34, %v1897_v33  ;;  %v1825_v39 = vld [vmem:[#allocation6 + $0x50] sm:$0xf]  ;;  %v1846_v43 = vor.u32 %v2574_v28, %v1843_v31 }
  0x1d   :  { %v2571_v40 = vld [vmem:[#allocation6 + $0x54] sm:$0xf0]  ;;  %v1889_v41 = vld [vmem:[#allocation6 + $0xd0] sm:$0xf]  ;;  %vm134_vm0 = vcmask 523264   ;;  %v1910_v45 = vor.u32 %v2590_v35, %v1907_v36  ;;  %vm1740_vm4 = vcmask 7168  }
  0x1e   :  { %144 = vmatpush.bf16.msra.mxu0 %v1760_v21  ;;  %v2587_v44 = vld [vmem:[#allocation6 + $0xd4] sm:$0xf0]  ;;  %v2572_v46 = vld [vmem:[#allocation6 + $0x64] sm:$0xf]  ;;  %v1835_v47 = vld [vmem:[#allocation6 + $0x68] sm:$0xf0]  ;;  %v1826_v49 = vor.u32 %v2571_v40, %v1825_v39 }
  0x1f   :  { %157 = vmatpush.bf16.msra.mxu1 %v1764_v27  ;;  %368 = vmatpush.bf16.msra.mxu2 %v1834_v32  ;;  %v2588_v48 = vld [vmem:[#allocation6 + $0xe4] sm:$0xf]  ;;  %v1899_v50 = vld [vmem:[#allocation6 + $0xe8] sm:$0xf0]  ;;  %v1890_v51 = vor.u32 %v2587_v44, %v1889_v41  ;;  %v1817_v52 = vld [vmem:[#allocation6 + $0x40] sm:$0xf]  ;;  %v1838_v57 = vor.u32 %v2572_v46, %v1835_v47 }
  0x20   :  { %381 = vmatpush.bf16.msra.mxu3 %v1898_v37  ;;  %v2569_v53 = vld [vmem:[#allocation6 + $0x44] sm:$0xf0]  ;;  %v79_v54 = vld [vmem:[#allocation2] sm:$0xf]  ;;  %v1881_v55 = vld [vmem:[#allocation6 + $0xc0] sm:$0xf]  ;;  %v1902_v58 = vor.u32 %v2588_v48, %v1899_v50 }
  0x21   :  { %v2585_v56 = vld [vmem:[#allocation6 + $0xc4] sm:$0xf0]  ;;  %v2570_v59 = vld [vmem:[#allocation6 + $0x54] sm:$0xf]  ;;  %v1827_v60 = vld [vmem:[#allocation6 + $0x58] sm:$0xf0]  ;;  %v1818_v62 = vor.u32 %v2569_v53, %v1817_v52 }
  0x22   :  { %145 = vmatpush.bf16.msra.mxu0 %v1752_v38  ;;  %v2586_v61 = vld [vmem:[#allocation6 + $0xd4] sm:$0xf]  ;;  %v1891_v63 = vld [vmem:[#allocation6 + $0xd8] sm:$0xf0]  ;;  %v1882_v0 = vor.u32 %v2585_v56, %v1881_v55  ;;  %v1809_v1 = vld [vmem:[#allocation6 + $0x30] sm:$0xf]  ;;  %v1830_v5 = vor.u32 %v2570_v59, %v1827_v60 }
  0x23   :  { %158 = vmatpush.bf16.msra.mxu1 %v1756_v42  ;;  %369 = vmatpush.bf16.msra.mxu2 %v1826_v49  ;;  %v2567_v2 = vld [vmem:[#allocation6 + $0x34] sm:$0xf0]  ;;  %v1873_v3 = vld [vmem:[#allocation6 + $0xb0] sm:$0xf]  ;;  %v1894_v6 = vor.u32 %v2586_v61, %v1891_v63  ;;  %v2568_v7 = vld [vmem:[#allocation6 + $0x44] sm:$0xf] }
  0x24   :  { %382 = vmatpush.bf16.msra.mxu3 %v1890_v51  ;;  %v2583_v4 = vld [vmem:[#allocation6 + $0xb4] sm:$0xf0]  ;;  %v1819_v8 = vld [vmem:[#allocation6 + $0x48] sm:$0xf0]  ;;  %v2584_v9 = vld [vmem:[#allocation6 + $0xc4] sm:$0xf]  ;;  %v1810_v10 = vor.u32 %v2567_v2, %v1809_v1 }
  0x25   :  { %1781 = vmatmul.msk.bf16.vlgmr.msra.gmra.mxu0 %vm134_vm0, %v79_v54  ;;  %v1883_v11 = vld [vmem:[#allocation6 + $0xc8] sm:$0xf0]  ;;  %v1874_v12 = vor.u32 %v2583_v4, %v1873_v3  ;;  %v1801_v13 = vld [vmem:[#allocation6 + $0x20] sm:$0xf]  ;;  %v2565_v14 = vld [vmem:[#allocation6 + $0x24] sm:$0xf0]  ;;  %v1822_v17 = vor.u32 %v2568_v7, %v1819_v8 }
  0x26   :  { %393 = vmatpush.bf16.msrb.mxu0 %v1846_v43  ;;  %1782 = vmatmul.msk.bf16.vlgmr.msra.gmra.mxu1 %vm134_vm0, %v79_v54  ;;  %v1865_v15 = vld [vmem:[#allocation6 + $0xa0] sm:$0xf]  ;;  %v2581_v16 = vld [vmem:[#allocation6 + $0xa4] sm:$0xf0]  ;;  %v1886_v18 = vor.u32 %v2584_v9, %v1883_v11  ;;  %v2566_v19 = vld [vmem:[#allocation6 + $0x34] sm:$0xf]  ;;  %v1802_v21 = vor.u32 %v2565_v14, %v1801_v13 }
  0x27   :  { %406 = vmatpush.bf16.msrb.mxu1 %v1910_v45  ;;  %370 = vmatpush.bf16.msra.mxu2 %v1818_v62  ;;  %v1811_v20 = vld [vmem:[#allocation6 + $0x38] sm:$0xf0]  ;;  %v2582_v22 = vld [vmem:[#allocation6 + $0xb4] sm:$0xf]  ;;  %v1866_v24 = vor.u32 %v2581_v16, %v1865_v15  ;;  %v2564_v27 = vld [vmem:[#allocation6 + $0x24] sm:$0xf] }
  0x28   :  { %383 = vmatpush.bf16.msra.mxu3 %v1882_v0  ;;  %v1875_v23 = vld [vmem:[#allocation6 + $0xb8] sm:$0xf0]  ;;  %v1814_v25 = vor.u32 %v2566_v19, %v1811_v20  ;;  %v1803_v28 = vld [vmem:[#allocation6 + $0x28] sm:$0xf0]  ;;  %v2580_v29 = vld [vmem:[#allocation6 + $0xa4] sm:$0xf] }
  0x29   :  { %v1878_v26 = vor.u32 %v2582_v22, %v1875_v23  ;;  %v1867_v30 = vld [vmem:[#allocation6 + $0xa8] sm:$0xf0]  ;;  %v1806_v31 = vor.u32 %v2564_v27, %v1803_v28  ;;  %v1793_v33 = vld [vmem:[#allocation6 + $0x10] sm:$0xf]  ;;  %v2563_v34 = vld [vmem:[#allocation6 + $0x14] sm:$0xf0] }
  0x2a   :  { %394 = vmatpush.bf16.msrb.mxu0 %v1838_v57  ;;  %v1870_v32 = vor.u32 %v2580_v29, %v1867_v30  ;;  %v1857_v35 = vld [vmem:[#allocation6 + $0x90] sm:$0xf]  ;;  %v1794_v36 = vor.u32 %v2563_v34, %v1793_v33  ;;  %v2579_v37 = vld [vmem:[#allocation6 + $0x94] sm:$0xf0]  ;;  %v2562_v38 = vld [vmem:[#allocation6 + $0x14] sm:$0xf] }
  0x2b   :  { %407 = vmatpush.bf16.msrb.mxu1 %v1902_v58  ;;  %371 = vmatpush.bf16.msra.mxu2 %v1810_v10  ;;  %v1795_v39 = vld [vmem:[#allocation6 + $0x18] sm:$0xf0]  ;;  %v1858_v40 = vor.u32 %v2579_v37, %v1857_v35  ;;  %v2578_v42 = vld [vmem:[#allocation6 + $0x94] sm:$0xf]  ;;  %v1785_v45 = vld [vmem:[#allocation6] sm:$0xf] }
  0x2c   :  { %384 = vmatpush.bf16.msra.mxu3 %v1874_v12  ;;  %v1798_v41 = vor.u32 %v2562_v38, %v1795_v39  ;;  %v1859_v43 = vld [vmem:[#allocation6 + $0x98] sm:$0xf0]  ;;  %v2561_v46 = vld [vmem:[#allocation6 + $0x4] sm:$0xf0]  ;;  %v1849_v47 = vld [vmem:[#allocation6 + $0x80] sm:$0xf] }
  0x2d   :  { %v1862_v44 = vor.u32 %v2578_v42, %v1859_v43  ;;  %v1786_v48 = vor.u32 %v2561_v46, %v1785_v45  ;;  %v2577_v49 = vld [vmem:[#allocation6 + $0x84] sm:$0xf0]  ;;  %v2560_v50 = vld [vmem:[#allocation6 + $0x4] sm:$0xf]  ;;  %v1787_v51 = vld [vmem:[#allocation6 + $0x8] sm:$0xf0] }
  0x2e   :  { %395 = vmatpush.bf16.msrb.mxu0 %v1830_v5  ;;  %v1850_v52 = vor.u32 %v2577_v49, %v1849_v47  ;;  %v1790_v53 = vor.u32 %v2560_v50, %v1787_v51  ;;  %v2576_v54 = vld [vmem:[#allocation6 + $0x84] sm:$0xf]  ;;  %v1851_v55 = vld [vmem:[#allocation6 + $0x88] sm:$0xf0]  ;;  %v2033_v57 = vld [vmem:[#allocation6 + $0x1f0] sm:$0xf] }
  0x2f   :  { %408 = vmatpush.bf16.msrb.mxu1 %v1894_v6  ;;  %372 = vmatpush.bf16.msra.mxu2 %v1802_v21  ;;  %v1854_v56 = vor.u32 %v2576_v54, %v1851_v55  ;;  %v2623_v58 = vld [vmem:[#allocation6 + $0x1f4] sm:$0xf0]  ;;  %v2622_v59 = vld [vmem:[#allocation6 + $0x1f4] sm:$0xf]  ;;  %v2035_v61 = vld [vmem:[#allocation6 + $0x1f8] sm:$0xf0] }
  0x30   :  { %385 = vmatpush.bf16.msra.mxu3 %v1866_v24  ;;  %v2034_v60 = vor.u32 %v2623_v58, %v2033_v57  ;;  %v2025_v62 = vld [vmem:[#allocation6 + $0x1e0] sm:$0xf]  ;;  %v2621_v63 = vld [vmem:[#allocation6 + $0x1e4] sm:$0xf0]  ;;  %v2038_v0 = vor.u32 %v2622_v59, %v2035_v61  ;;  %v2620_v1 = vld [vmem:[#allocation6 + $0x1e4] sm:$0xf] }
  0x31   :  { %v2027_v2 = vld [vmem:[#allocation6 + $0x1e8] sm:$0xf0]  ;;  %v1969_v3 = vld [vmem:[#allocation6 + $0x170] sm:$0xf]  ;;  %v2026_v4 = vor.u32 %v2621_v63, %v2025_v62  ;;  %v2607_v5 = vld [vmem:[#allocation6 + $0x174] sm:$0xf0] }
  0x32   :  { %396 = vmatpush.bf16.msrb.mxu0 %v1822_v17  ;;  %v2606_v6 = vld [vmem:[#allocation6 + $0x174] sm:$0xf]  ;;  %v1971_v7 = vld [vmem:[#allocation6 + $0x178] sm:$0xf0]  ;;  %v2030_v8 = vor.u32 %v2620_v1, %v2027_v2  ;;  %v1970_v9 = vor.u32 %v2607_v5, %v1969_v3  ;;  %v2017_v11 = vld [vmem:[#allocation6 + $0x1d0] sm:$0xf] }
  0x33   :  { %409 = vmatpush.bf16.msrb.mxu1 %v1886_v18  ;;  %373 = vmatpush.bf16.msra.mxu2 %v1794_v36  ;;  %v1974_v10 = vor.u32 %v2606_v6, %v1971_v7  ;;  %v2619_v12 = vld [vmem:[#allocation6 + $0x1d4] sm:$0xf0]  ;;  %v2618_v13 = vld [vmem:[#allocation6 + $0x1d4] sm:$0xf]  ;;  %v2019_v14 = vld [vmem:[#allocation6 + $0x1d8] sm:$0xf0] }
  0x34   :  { %386 = vmatpush.bf16.msra.mxu3 %v1858_v40  ;;  %v1961_v15 = vld [vmem:[#allocation6 + $0x160] sm:$0xf]  ;;  %v2605_v16 = vld [vmem:[#allocation6 + $0x164] sm:$0xf0]  ;;  %v2604_v18 = vld [vmem:[#allocation6 + $0x164] sm:$0xf]  ;;  %v2018_v20 = vor.u32 %v2619_v12, %v2017_v11  ;;  %v2022_v24 = vor.u32 %v2618_v13, %v2019_v14 }
  0x35   :  { %v1962_v17 = vor.u32 %v2605_v16, %v1961_v15  ;;  %v1963_v19 = vld [vmem:[#allocation6 + $0x168] sm:$0xf0]  ;;  %v2009_v22 = vld [vmem:[#allocation6 + $0x1c0] sm:$0xf]  ;;  %v2617_v23 = vld [vmem:[#allocation6 + $0x1c4] sm:$0xf0] }
  0x36   :  { %397 = vmatpush.bf16.msrb.mxu0 %v1814_v25  ;;  %v1966_v21 = vor.u32 %v2604_v18, %v1963_v19  ;;  %v1953_v25 = vld [vmem:[#allocation6 + $0x150] sm:$0xf]  ;;  %v2602_v27 = vld [vmem:[#allocation6 + $0x154] sm:$0xf]  ;;  %v2616_v28 = vld [vmem:[#allocation6 + $0x1c4] sm:$0xf]  ;;  %v2010_v34 = vor.u32 %v2617_v23, %v2009_v22 }
  0x37   :  { %410 = vmatpush.bf16.msrb.mxu1 %v1878_v26  ;;  %374 = vmatpush.bf16.msra.mxu2 %v1786_v48  ;;  %v2603_v26 = vld [vmem:[#allocation6 + $0x154] sm:$0xf0]  ;;  %v2011_v29 = vld [vmem:[#allocation6 + $0x1c8] sm:$0xf0]  ;;  %v1955_v30 = vld [vmem:[#allocation6 + $0x158] sm:$0xf0] }
  0x38   :  { %387 = vmatpush.bf16.msra.mxu3 %v1850_v52  ;;  %v1945_v33 = vld [vmem:[#allocation6 + $0x140] sm:$0xf]  ;;  %v2601_v35 = vld [vmem:[#allocation6 + $0x144] sm:$0xf0]  ;;  %v2600_v36 = vld [vmem:[#allocation6 + $0x144] sm:$0xf]  ;;  %v2014_v38 = vor.u32 %v2616_v28, %v2011_v29 }
  0x39   :  { %v1947_v37 = vld [vmem:[#allocation6 + $0x148] sm:$0xf0]  ;;  %v2001_v39 = vld [vmem:[#allocation6 + $0x1b0] sm:$0xf]  ;;  %v2615_v40 = vld [vmem:[#allocation6 + $0x1b4] sm:$0xf0]  ;;  %v1946_v43 = vor.u32 %v2601_v35, %v1945_v33 }
  0x3a   :  { %398 = vmatpush.bf16.msrb.mxu0 %v1806_v31  ;;  %v1954_v31 = vor.u32 %v2603_v26, %v1953_v25  ;;  %v2003_v42 = vld [vmem:[#allocation6 + $0x1b8] sm:$0xf0]  ;;  %v88_v45 = vld [vmem:[#allocation7] ss:$8 sm:$0x3]  ;;  %v2002_v46 = vor.u32 %v2615_v40, %v2001_v39 }
  0x3b   :  { %411 = vmatpush.bf16.msrb.mxu1 %v1870_v32  ;;  %623 = vmatpush.bf16.msrb.mxu2 %v1970_v9  ;;  %v1958_v32 = vor.u32 %v2602_v27, %v1955_v30  ;;  %v1993_v48 = vld [vmem:[#allocation6 + $0x1a0] sm:$0xf]  ;;  %v2613_v49 = vld [vmem:[#allocation6 + $0x1a4] sm:$0xf0]  ;;  %v2612_v50 = vld [vmem:[#allocation6 + $0x1a4] sm:$0xf] }
  0x3c   :  { %636 = vmatpush.bf16.msrb.mxu3 %v2034_v60  ;;  %v1995_v51 = vld [vmem:[#allocation6 + $0x1a8] sm:$0xf0]  ;;  %v1994_v52 = vor.u32 %v2613_v49, %v1993_v48  ;;  %v91_v55 = vperm.slane %v88_v45, 1  ;;  %v1937_v2 = vld [vmem:[#allocation6 + $0x130] sm:$0xf] }
  0x3d   :  { %v1998_v54 = vor.u32 %v2612_v50, %v1995_v51  ;;  %v2599_v3 = vld [vmem:[#allocation6 + $0x134] sm:$0xf0]  ;;  %v1939_v6 = vld [vmem:[#allocation6 + $0x138] sm:$0xf0]  ;;  %v1929_v14 = vld [vmem:[#allocation6 + $0x120] sm:$0xf] }
  0x3e   :  { %399 = vmatpush.bf16.msrb.mxu0 %v1798_v41  ;;  %v2614_v41 = vld [vmem:[#allocation6 + $0x1b4] sm:$0xf]  ;;  %v1938_v5 = vor.u32 %v2599_v3, %v1937_v2  ;;  %v2611_v9 = vld [vmem:[#allocation6 + $0x194] sm:$0xf0]  ;;  %v1987_v12 = vld [vmem:[#allocation6 + $0x198] sm:$0xf0] }
  0x3f   :  { %412 = vmatpush.bf16.msrb.mxu1 %v1862_v44  ;;  %624 = vmatpush.bf16.msrb.mxu2 %v1962_v17  ;;  %v1950_v44 = vor.u32 %v2600_v36, %v1947_v37  ;;  %v2006_v47 = vor.u32 %v2614_v41, %v2003_v42  ;;  %v2597_v15 = vld [vmem:[#allocation6 + $0x124] sm:$0xf0]  ;;  %v2596_v16 = vld [vmem:[#allocation6 + $0x124] sm:$0xf]  ;;  %v1931_v18 = vld [vmem:[#allocation6 + $0x128] sm:$0xf0] }
  0x40   :  { %637 = vmatpush.bf16.msrb.mxu3 %v2026_v4  ;;  %v2598_v4 = vld [vmem:[#allocation6 + $0x134] sm:$0xf]  ;;  %v1930_v17 = vor.u32 %v2597_v15, %v1929_v14  ;;  %v1934_v19 = vor.u32 %v2596_v16, %v1931_v18  ;;  %v2608_v22 = vld [vmem:[#allocation6 + $0x184] sm:$0xf]  ;;  %v1921_v26 = vld [vmem:[#allocation6 + $0x110] sm:$0xf] }
  0x41   :  { %v1942_v7 = vor.u32 %v2598_v4, %v1939_v6  ;;  %v2595_v27 = vld [vmem:[#allocation6 + $0x114] sm:$0xf0]  ;;  %v2594_v29 = vld [vmem:[#allocation6 + $0x114] sm:$0xf]  ;;  %v1923_v30 = vld [vmem:[#allocation6 + $0x118] sm:$0xf0] }
  0x42   :  { %400 = vmatpush.bf16.msrb.mxu0 %v1790_v53  ;;  %v90_v53 = vperm.slane %v88_v45, 0  ;;  %v1922_v28 = vor.u32 %v2595_v27, %v1921_v26  ;;  %v2593_v33 = vld [vmem:[#allocation6 + $0x104] sm:$0xf0]  ;;  %v1915_v36 = vld [vmem:[#allocation6 + $0x108] sm:$0xf0] }
  0x43   :  { %413 = vmatpush.bf16.msrb.mxu1 %v1854_v56  ;;  %625 = vmatpush.bf16.msrb.mxu2 %v1954_v31  ;;  %v1926_v31 = vor.u32 %v2594_v29, %v1923_v30  ;;  %v2655_v39 = vld [vmem:[#allocation6 + $0x2f4] sm:$0xf0]  ;;  %v2654_v40 = vld [vmem:[#allocation6 + $0x2f4] sm:$0xf]  ;;  %v2163_v42 = vld [vmem:[#allocation6 + $0x2f8] sm:$0xf0] }
  0x44   :  { %638 = vmatpush.bf16.msrb.mxu3 %v2018_v20  ;;  %v1977_v20 = vld [vmem:[#allocation6 + $0x180] sm:$0xf]  ;;  %v2166_v45 = vor.u32 %v2654_v40, %v2163_v42  ;;  %v2097_v48 = vld [vmem:[#allocation6 + $0x270] sm:$0xf]  ;;  %v2639_v50 = vld [vmem:[#allocation6 + $0x274] sm:$0xf0] }
  0x45   :  { %v2638_v51 = vld [vmem:[#allocation6 + $0x274] sm:$0xf]  ;;  %v2091_v2 = vld [vmem:[#allocation6 + $0x268] sm:$0xf0]  ;;  %v2137_v6 = vld [vmem:[#allocation6 + $0x2c0] sm:$0xf] }
  0x46   :  { %649 = vmatpush.bf16.msra.mxu0 %v1974_v10  ;;  %v2610_v10 = vld [vmem:[#allocation6 + $0x194] sm:$0xf]  ;;  %v2073_v42 = vld [vmem:[#allocation6 + $0x240] sm:$0xf] }
  0x47   :  { %662 = vmatpush.bf16.msra.mxu1 %v2038_v0  ;;  %626 = vmatpush.bf16.msrb.mxu2 %v1946_v43  ;;  %v1990_v13 = vor.u32 %v2610_v10, %v1987_v12  ;;  %v2153_v43 = vld [vmem:[#allocation6 + $0x2e0] sm:$0xf] }
  0x48   :  { %639 = vmatpush.bf16.msrb.mxu3 %v2010_v34  ;;  %v2592_v34 = vld [vmem:[#allocation6 + $0x104] sm:$0xf]  ;;  %v201_v10 = vld [vmem:[#allocation7 + $0x1] ss:$8 sm:$0x3] }
  0x49   :  { %v1918_v37 = vor.u32 %v2592_v34, %v1915_v36  ;;  %v203_v18 = vperm.slane %v201_v10, 0 }
  0x4a   :  { %650 = vmatpush.bf16.msra.mxu0 %v1966_v21  ;;  %v2609_v21 = vld [vmem:[#allocation6 + $0x184] sm:$0xf0] }
  0x4b   :  { %663 = vmatpush.bf16.msra.mxu1 %v2030_v8  ;;  %v1985_v8 = vld [vmem:[#allocation6 + $0x190] sm:$0xf]  ;;  %627 = vmatpush.bf16.msrb.mxu2 %v1938_v5  ;;  %v1978_v23 = vor.u32 %v2609_v21, %v1977_v20 }
  0x4c   :  { %640 = vmatpush.bf16.msrb.mxu3 %v2002_v46  ;;  %v1986_v11 = vor.u32 %v2611_v9, %v1985_v8  ;;  %v2652_v46 = vld [vmem:[#allocation6 + $0x2e4] sm:$0xf]  ;;  %v2139_v9 = vld [vmem:[#allocation6 + $0x2c8] sm:$0xf0] }
  0x4d   :  { %v2648_v8 = vld [vmem:[#allocation6 + $0x2c4] sm:$0xf] }
  0x4e   :  { %651 = vmatpush.bf16.msra.mxu0 %v1958_v32  ;;  %v1913_v32 = vld [vmem:[#allocation6 + $0x100] sm:$0xf]  ;;  %v2142_v12 = vor.u32 %v2648_v8, %v2139_v9  ;;  %v2059_v9 = vld [vmem:[#allocation6 + $0x228] sm:$0xf0] }
  0x4f   :  { %664 = vmatpush.bf16.msra.mxu1 %v2022_v24  ;;  %628 = vmatpush.bf16.msrb.mxu2 %v1930_v17  ;;  %v1979_v24 = vld [vmem:[#allocation6 + $0x188] sm:$0xf0]  ;;  %v1914_v35 = vor.u32 %v2593_v33, %v1913_v32  ;;  %v2635_v32 = vld [vmem:[#allocation6 + $0x254] sm:$0xf0]  ;;  %v2634_v33 = vld [vmem:[#allocation6 + $0x254] sm:$0xf] }
  0x50   :  { %641 = vmatpush.bf16.msrb.mxu3 %v1994_v52  ;;  %v1982_v25 = vor.u32 %v2608_v22, %v1979_v24  ;;  %v2099_v52 = vld [vmem:[#allocation6 + $0x278] sm:$0xf0] }
  0x52   :  { %652 = vmatpush.bf16.msra.mxu0 %v1950_v44  ;;  %v2653_v44 = vld [vmem:[#allocation6 + $0x2e4] sm:$0xf0] }
  0x53   :  { %665 = vmatpush.bf16.msra.mxu1 %v2014_v38  ;;  %629 = vmatpush.bf16.msrb.mxu2 %v1922_v28  ;;  %v2161_v38 = vld [vmem:[#allocation6 + $0x2f0] sm:$0xf]  ;;  %v2154_v49 = vor.u32 %v2653_v44, %v2153_v43  ;;  %v2633_v43 = vld [vmem:[#allocation6 + $0x244] sm:$0xf0] }
  0x54   :  { %642 = vmatpush.bf16.msrb.mxu3 %v1986_v11  ;;  %v2162_v41 = vor.u32 %v2655_v39, %v2161_v38  ;;  %v2647_v38 = vld [vmem:[#allocation6 + $0x2b4] sm:$0xf0]  ;;  %v2646_v39 = vld [vmem:[#allocation6 + $0x2b4] sm:$0xf] }
  0x56   :  { %653 = vmatpush.bf16.msra.mxu0 %v1942_v7  ;;  %v2649_v7 = vld [vmem:[#allocation6 + $0x2c4] sm:$0xf0] }
  0x57   :  { %666 = vmatpush.bf16.msra.mxu1 %v2006_v47  ;;  %630 = vmatpush.bf16.msrb.mxu2 %v1914_v35  ;;  %v2155_v47 = vld [vmem:[#allocation6 + $0x2e8] sm:$0xf0]  ;;  %v2138_v11 = vor.u32 %v2649_v7, %v2137_v6  ;;  %v2083_v35 = vld [vmem:[#allocation6 + $0x258] sm:$0xf0]  ;;  %v2629_v6 = vld [vmem:[#allocation6 + $0x224] sm:$0xf0] }
  0x58   :  { %643 = vmatpush.bf16.msrb.mxu3 %v1978_v23  ;;  %v2086_v36 = vor.u32 %v2634_v33, %v2083_v35  ;;  %v2628_v7 = vld [vmem:[#allocation6 + $0x224] sm:$0xf]  ;;  %v2291_v33 = vld [vmem:[#allocation6 + $0x3f8] sm:$0xf0]  ;;  %v2685_v35 = vld [vmem:[#allocation6 + $0x3e4] sm:$0xf0] }
  0x5a   :  { %654 = vmatpush.bf16.msra.mxu0 %v1934_v19 }
  0x5b   :  { %667 = vmatpush.bf16.msra.mxu1 %v1998_v54  ;;  %v2098_v54 = vor.u32 %v2639_v50, %v2097_v48  ;;  %v2645_v50 = vld [vmem:[#allocation6 + $0x2a4] sm:$0xf0] }
  0x5e   :  { %655 = vmatpush.bf16.msra.mxu0 %v1926_v31  ;;  %v2081_v31 = vld [vmem:[#allocation6 + $0x250] sm:$0xf] }
  0x5f   :  { %668 = vmatpush.bf16.msra.mxu1 %v1990_v13  ;;  %v204_v13 = vperm.slane %v201_v10, 1  ;;  %v2082_v34 = vor.u32 %v2635_v32, %v2081_v31  ;;  %v2062_v10 = vor.u32 %v2628_v7, %v2059_v9  ;;  %v2686_v31 = vld [vmem:[#allocation6 + $0x3f4] sm:$0xf] }
  0x62   :  { %656 = vmatpush.bf16.msra.mxu0 %v1918_v37  ;;  %v2129_v37 = vld [vmem:[#allocation6 + $0x2b0] sm:$0xf] }
  0x63   :  { %669 = vmatpush.bf16.msra.mxu1 %v1982_v25  ;;  %v2130_v40 = vor.u32 %v2647_v38, %v2129_v37  ;;  %v2684_v37 = vld [vmem:[#allocation6 + $0x3e4] sm:$0xf]  ;;  %v2283_v38 = vld [vmem:[#allocation6 + $0x3e8] sm:$0xf0] }
  0xa2   :  { %v147_v56 = vpop.f32.mrf.mxu0 }
  0xa3   :  { %v148_v57 = vadd.f32 %v147_v56, %v90_v53  ;;  %v160_v58 = vpop.f32.mrf.mxu1  ;;  %v2158_v53 = vor.u32 %v2652_v46, %v2155_v47  ;;  %v2145_v56 = vld [vmem:[#allocation6 + $0x2d0] sm:$0xf]  ;;  %v2632_v46 = vld [vmem:[#allocation6 + $0x244] sm:$0xf]  ;;  %v2075_v47 = vld [vmem:[#allocation6 + $0x248] sm:$0xf0] }
  0xa4   :  { %v161_v59 = vadd.f32 %v160_v58, %v91_v55  ;;  %v2102_v55 = vor.u32 %v2638_v51, %v2099_v52  ;;  %v2650_v58 = vld [vmem:[#allocation6 + $0x2d4] sm:$0xf]  ;;  %v2078_v48 = vor.u32 %v2632_v46, %v2075_v47  ;;  %v2644_v51 = vld [vmem:[#allocation6 + $0x2a4] sm:$0xf]  ;;  %v2273_v47 = vld [vmem:[#allocation6 + $0x3d0] sm:$0xf] }
  0xa5   :  { %v2913_v60 = vmax.f32 %v148_v57, 0.0  ;;  %v2651_v57 = vld [vmem:[#allocation6 + $0x2d4] sm:$0xf0] }
  0xa6   :  { %v2915_v61 = vmax.f32 %v161_v59, 0.0  ;;  %v2147_v59 = vld [vmem:[#allocation6 + $0x2d8] sm:$0xf0]  ;;  %v2146_v3 = vor.u32 %v2651_v57, %v2145_v56  ;;  %v2631_v56 = vld [vmem:[#allocation6 + $0x234] sm:$0xf0] }
  0xa7   :  { %v198_v62 = vpack.c.bf16 %v2913_v60, %v2913_v60  ;;  %v2150_v5 = vor.u32 %v2650_v58, %v2147_v59  ;;  %v2630_v58 = vld [vmem:[#allocation6 + $0x234] sm:$0xf]  ;;  %v2067_v59 = vld [vmem:[#allocation6 + $0x238] sm:$0xf0] }
  0xa8   :  { %v199_v63 = vpack.c.bf16 %v2915_v61, %v2915_v61 }
  0xa9   :  { %375 = vmatmul.bf16.vlgmr.msra.gmra.mxu2 %v198_v62  ;;  %401 = vmatmul.bf16.vlgmr.msrb.gmra.mxu0 %v198_v62  ;;  %v2089_v62 = vld [vmem:[#allocation6 + $0x260] sm:$0xf] }
  0xaa   :  { %388 = vmatmul.bf16.vlgmr.msra.gmra.mxu3 %v199_v63  ;;  %414 = vmatmul.bf16.vlgmr.msrb.gmra.mxu1 %v199_v63  ;;  %v149_v0 = vpop.f32.mrf.mxu0  ;;  %v2637_v63 = vld [vmem:[#allocation6 + $0x264] sm:$0xf0] }
  0xab   :  { %v162_v1 = vpop.f32.mrf.mxu1  ;;  %894 = vmatpush.bf16.msra.mxu3 %v2162_v41  ;;  %920 = vmatpush.bf16.msrb.mxu1 %v2166_v45  ;;  %v2090_v0 = vor.u32 %v2637_v63, %v2089_v62  ;;  %v2131_v41 = vld [vmem:[#allocation6 + $0x2b8] sm:$0xf0]  ;;  %v2074_v45 = vor.u32 %v2633_v43, %v2073_v42  ;;  %v2070_v62 = vor.u32 %v2630_v58, %v2067_v59  ;;  %v2113_v63 = vld [vmem:[#allocation6 + $0x290] sm:$0xf]  ;;  %v2670_v42 = vld [vmem:[#allocation6 + $0x374] sm:$0xf] }
  0xac   :  { %881 = vmatpush.bf16.msra.mxu2 %v2098_v54  ;;  %907 = vmatpush.bf16.msrb.mxu0 %v2102_v55  ;;  %v2636_v1 = vld [vmem:[#allocation6 + $0x264] sm:$0xf]  ;;  %v2134_v44 = vor.u32 %v2646_v39, %v2131_v41  ;;  %v2065_v55 = vld [vmem:[#allocation6 + $0x230] sm:$0xf]  ;;  %v2671_v41 = vld [vmem:[#allocation6 + $0x374] sm:$0xf0] }
  0xad   :  { %v2094_v4 = vor.u32 %v2636_v1, %v2091_v2  ;;  %v2066_v57 = vor.u32 %v2631_v56, %v2065_v55  ;;  %v2642_v1 = vld [vmem:[#allocation6 + $0x294] sm:$0xf]  ;;  %v2225_v39 = vld [vmem:[#allocation6 + $0x370] sm:$0xf]  ;;  %v2227_v43 = vld [vmem:[#allocation6 + $0x378] sm:$0xf0] }
  0xae   :  { %v2230_v46 = vor.u32 %v2670_v42, %v2227_v43  ;;  %v2219_v55 = vld [vmem:[#allocation6 + $0x368] sm:$0xf0]  ;;  %v457_v56 = vld [vmem:[#allocation7 + $0x2] ss:$8 sm:$0x3] }
  0xaf   :  { %895 = vmatpush.bf16.msra.mxu3 %v2154_v49  ;;  %921 = vmatpush.bf16.msrb.mxu1 %v2158_v53  ;;  %v2121_v49 = vld [vmem:[#allocation6 + $0x2a0] sm:$0xf]  ;;  %v2123_v53 = vld [vmem:[#allocation6 + $0x2a8] sm:$0xf0]  ;;  %v2676_v43 = vld [vmem:[#allocation6 + $0x3a4] sm:$0xf] }
  0xb0   :  { %882 = vmatpush.bf16.msra.mxu2 %v2090_v0  ;;  %908 = vmatpush.bf16.msrb.mxu0 %v2094_v4  ;;  %v2122_v52 = vor.u32 %v2645_v50, %v2121_v49  ;;  %v2126_v54 = vor.u32 %v2644_v51, %v2123_v53  ;;  %v2643_v0 = vld [vmem:[#allocation6 + $0x294] sm:$0xf0]  ;;  %v2682_v49 = vld [vmem:[#allocation6 + $0x3d4] sm:$0xf]  ;;  %v2275_v50 = vld [vmem:[#allocation6 + $0x3d8] sm:$0xf0] }
  0xb1   :  { %v2114_v2 = vor.u32 %v2643_v0, %v2113_v63  ;;  %v2217_v51 = vld [vmem:[#allocation6 + $0x360] sm:$0xf]  ;;  %v2278_v63 = vor.u32 %v2682_v49, %v2275_v50  ;;  %v2209_v0 = vld [vmem:[#allocation6 + $0x350] sm:$0xf]  ;;  %v2195_v50 = vld [vmem:[#allocation6 + $0x338] sm:$0xf0] }
  0xb2   :  { %v2265_v59 = vld [vmem:[#allocation6 + $0x3c0] sm:$0xf] }
  0xb3   :  { %896 = vmatpush.bf16.msra.mxu3 %v2146_v3  ;;  %922 = vmatpush.bf16.msrb.mxu1 %v2150_v5  ;;  %v2115_v3 = vld [vmem:[#allocation6 + $0x298] sm:$0xf0]  ;;  %v2057_v5 = vld [vmem:[#allocation6 + $0x220] sm:$0xf] }
  0xb4   :  { %883 = vmatpush.bf16.msra.mxu2 %v2082_v34  ;;  %909 = vmatpush.bf16.msrb.mxu0 %v2086_v36  ;;  %v2118_v4 = vor.u32 %v2642_v1, %v2115_v3  ;;  %v2058_v8 = vor.u32 %v2629_v6, %v2057_v5  ;;  %v2281_v34 = vld [vmem:[#allocation6 + $0x3e0] sm:$0xf]  ;;  %v2294_v36 = vor.u32 %v2686_v31, %v2291_v33  ;;  %v2667_v1 = vld [vmem:[#allocation6 + $0x354] sm:$0xf0]  ;;  %v2267_v5 = vld [vmem:[#allocation6 + $0x3c8] sm:$0xf0] }
  0xb5   :  { %v2211_v6 = vld [vmem:[#allocation6 + $0x358] sm:$0xf0]  ;;  %v2210_v7 = vor.u32 %v2667_v1, %v2209_v0  ;;  %v2678_v31 = vld [vmem:[#allocation6 + $0x3b4] sm:$0xf]  ;;  %v2187_v0 = vld [vmem:[#allocation6 + $0x328] sm:$0xf0] }
  0xb6   :  { %v2259_v33 = vld [vmem:[#allocation6 + $0x3b8] sm:$0xf0] }
  0xb7   :  { %897 = vmatpush.bf16.msra.mxu3 %v2138_v11  ;;  %923 = vmatpush.bf16.msrb.mxu1 %v2142_v12  ;;  %v2105_v11 = vld [vmem:[#allocation6 + $0x280] sm:$0xf]  ;;  %v2641_v12 = vld [vmem:[#allocation6 + $0x284] sm:$0xf0] }
  0xb8   :  { %884 = vmatpush.bf16.msra.mxu2 %v2074_v45  ;;  %910 = vmatpush.bf16.msrb.mxu0 %v2078_v48  ;;  %v2226_v45 = vor.u32 %v2671_v41, %v2225_v39  ;;  %v2683_v48 = vld [vmem:[#allocation6 + $0x3d4] sm:$0xf0]  ;;  %v2203_v39 = vld [vmem:[#allocation6 + $0x348] sm:$0xf0] }
  0xbb   :  { %898 = vmatpush.bf16.msra.mxu3 %v2130_v40  ;;  %924 = vmatpush.bf16.msrb.mxu1 %v2134_v44  ;;  %v2282_v40 = vor.u32 %v2685_v35, %v2281_v34  ;;  %v2286_v44 = vor.u32 %v2684_v37, %v2283_v38  ;;  %v2262_v34 = vor.u32 %v2678_v31, %v2259_v33  ;;  %v2201_v35 = vld [vmem:[#allocation6 + $0x340] sm:$0xf]  ;;  %v2664_v37 = vld [vmem:[#allocation6 + $0x344] sm:$0xf]  ;;  %v2353_v31 = vld [vmem:[#allocation6 + $0x470] sm:$0xf] }
  0xbc   :  { %885 = vmatpush.bf16.msra.mxu2 %v2066_v57  ;;  %911 = vmatpush.bf16.msrb.mxu0 %v2070_v62  ;;  %v2274_v57 = vor.u32 %v2683_v48, %v2273_v47  ;;  %v2681_v62 = vld [vmem:[#allocation6 + $0x3c4] sm:$0xf0]  ;;  %v2206_v41 = vor.u32 %v2664_v37, %v2203_v39  ;;  %v2663_v47 = vld [vmem:[#allocation6 + $0x334] sm:$0xf0]  ;;  %v2662_v48 = vld [vmem:[#allocation6 + $0x334] sm:$0xf] }
  0xbd   :  { %v2266_v9 = vor.u32 %v2681_v62, %v2265_v59  ;;  %v2661_v59 = vld [vmem:[#allocation6 + $0x324] sm:$0xf0]  ;;  %v2660_v62 = vld [vmem:[#allocation6 + $0x324] sm:$0xf]  ;;  %v2703_v33 = vld [vmem:[#allocation6 + $0x474] sm:$0xf0] }
  0xbe   :  { %v2190_v1 = vor.u32 %v2660_v62, %v2187_v0  ;;  %v2354_v37 = vor.u32 %v2703_v33, %v2353_v31  ;;  %v2401_v39 = vld [vmem:[#allocation6 + $0x4d0] sm:$0xf]  ;;  %v2709_v33 = vld [vmem:[#allocation6 + $0x4a4] sm:$0xf0] }
  0xbf   :  { %899 = vmatpush.bf16.msra.mxu3 %v2122_v52  ;;  %925 = vmatpush.bf16.msrb.mxu1 %v2126_v54  ;;  %v2669_v52 = vld [vmem:[#allocation6 + $0x364] sm:$0xf0]  ;;  %v2668_v54 = vld [vmem:[#allocation6 + $0x364] sm:$0xf] }
  0xc0   :  { %886 = vmatpush.bf16.msra.mxu2 %v2058_v8  ;;  %912 = vmatpush.bf16.msrb.mxu0 %v2062_v10  ;;  %v2218_v53 = vor.u32 %v2669_v52, %v2217_v51  ;;  %v2222_v58 = vor.u32 %v2668_v54, %v2219_v55  ;;  %v460_v10 = vperm.slane %v457_v56, 1  ;;  %v2198_v51 = vor.u32 %v2662_v48, %v2195_v50  ;;  %v2241_v52 = vld [vmem:[#allocation6 + $0x390] sm:$0xf]  ;;  %v2674_v55 = vld [vmem:[#allocation6 + $0x394] sm:$0xf] }
  0xc1   :  { %v2393_v50 = vld [vmem:[#allocation6 + $0x4c0] sm:$0xf] }
  0xc3   :  { %900 = vmatpush.bf16.msra.mxu3 %v2114_v2  ;;  %926 = vmatpush.bf16.msrb.mxu1 %v2118_v4  ;;  %v2666_v2 = vld [vmem:[#allocation6 + $0x354] sm:$0xf]  ;;  %v2680_v4 = vld [vmem:[#allocation6 + $0x3c4] sm:$0xf] }
  0xc4   :  { %v2214_v8 = vor.u32 %v2666_v2, %v2211_v6  ;;  %v2233_v2 = vld [vmem:[#allocation6 + $0x380] sm:$0xf]  ;;  %v2235_v6 = vld [vmem:[#allocation6 + $0x388] sm:$0xf0] }
 0x126   :  { %v402_v14 = vpop.f32.mrf.mxu0 }
 0x127   :  { %v403_v15 = vadd.f32 %v402_v14, %v204_v13  ;;  %v415_v16 = vpop.f32.mrf.mxu1  ;;  %v2106_v13 = vor.u32 %v2641_v12, %v2105_v11  ;;  %v2640_v14 = vld [vmem:[#allocation6 + $0x284] sm:$0xf]  ;;  %v2270_v11 = vor.u32 %v2680_v4, %v2267_v5 }
 0x128   :  { %v2672_v4 = vld [vmem:[#allocation6 + $0x384] sm:$0xf] }
 0x129   :  { %v416_v17 = vadd.f32 %v415_v16, %v403_v15  ;;  %v2107_v15 = vld [vmem:[#allocation6 + $0x288] sm:$0xf0]  ;;  %901 = vmatpush.bf16.msra.mxu3 %v2106_v13 }
 0x12a   :  { %v2110_v16 = vor.u32 %v2640_v14, %v2107_v15 }
 0x12b   :  { %v420_v19 = vmax.f32 %v416_v17, 0.0  ;;  %v2049_v17 = vld [vmem:[#allocation6 + $0x210] sm:$0xf] }
 0x12c   :  { %v376_v20 = vpop.f32.mrf.mxu2  ;;  %927 = vmatpush.bf16.msrb.mxu1 %v2110_v16 }
 0x12d   :  { %v455_v21 = vpack.c.bf16 %v420_v19, %v420_v19  ;;  %v377_v22 = vadd.f32 %v376_v20, %v203_v18  ;;  %v389_v23 = vpop.f32.mrf.mxu3  ;;  %v2627_v18 = vld [vmem:[#allocation6 + $0x214] sm:$0xf0]  ;;  %v2626_v19 = vld [vmem:[#allocation6 + $0x214] sm:$0xf] }
 0x12e   :  { %v404_v24 = vpop.f32.mrf.mxu0  ;;  %v2050_v20 = vor.u32 %v2627_v18, %v2049_v17  ;;  %v459_v17 = vperm.slane %v457_v56, 0  ;;  %v2243_v56 = vld [vmem:[#allocation6 + $0x398] sm:$0xf0] }
 0x12f   :  { %v390_v25 = vadd.f32 %v389_v23, %v377_v22  ;;  %v417_v26 = vpop.f32.mrf.mxu1  ;;  %644 = vmatmul.bf16.vlgmr.msrb.gmra.mxu3 %v455_v21  ;;  %670 = vmatmul.bf16.vlgmr.msra.gmra.mxu1 %v455_v21  ;;  %v2051_v21 = vld [vmem:[#allocation6 + $0x218] sm:$0xf0]  ;;  %v2041_v23 = vld [vmem:[#allocation6 + $0x200] sm:$0xf]  ;;  %v2625_v24 = vld [vmem:[#allocation6 + $0x204] sm:$0xf0] }
 0x130   :  { %v2054_v22 = vor.u32 %v2626_v19, %v2051_v21  ;;  %887 = vmatpush.bf16.msra.mxu2 %v2050_v20  ;;  %v2042_v26 = vor.u32 %v2625_v24, %v2041_v23  ;;  %1176 = vmatpush.bf16.msra.mxu1 %v2294_v36  ;;  %v2665_v36 = vld [vmem:[#allocation6 + $0x344] sm:$0xf0] }
 0x131   :  { %v419_v27 = vmax.f32 %v390_v25, 0.0  ;;  %v2624_v25 = vld [vmem:[#allocation6 + $0x204] sm:$0xf]  ;;  %v2202_v38 = vor.u32 %v2665_v36, %v2201_v35  ;;  %v2355_v35 = vld [vmem:[#allocation6 + $0x478] sm:$0xf0] }
 0x132   :  { %913 = vmatpush.bf16.msrb.mxu0 %v2054_v22 }
 0x133   :  { %v454_v28 = vpack.c.bf16 %v419_v27, %v419_v27  ;;  %v2043_v27 = vld [vmem:[#allocation6 + $0x208] sm:$0xf0] }
 0x134   :  { %v378_v29 = vpop.f32.mrf.mxu2  ;;  %888 = vmatpush.bf16.msra.mxu2 %v2042_v26  ;;  %1177 = vmatpush.bf16.msra.mxu1 %v2286_v44  ;;  %v2251_v44 = vld [vmem:[#allocation6 + $0x3a8] sm:$0xf0] }
 0x135   :  { %v391_v30 = vpop.f32.mrf.mxu3  ;;  %631 = vmatmul.bf16.vlgmr.msrb.gmra.mxu2 %v454_v28  ;;  %657 = vmatmul.bf16.vlgmr.msra.gmra.mxu0 %v454_v28  ;;  %v2046_v28 = vor.u32 %v2624_v25, %v2043_v27  ;;  %v2289_v29 = vld [vmem:[#allocation6 + $0x3f0] sm:$0xf] }
 0x136   :  { %v2687_v30 = vld [vmem:[#allocation6 + $0x3f4] sm:$0xf0] }
 0x137   :  { %914 = vmatpush.bf16.msrb.mxu0 %v2046_v28  ;;  %v2290_v32 = vor.u32 %v2687_v30, %v2289_v29  ;;  %v2679_v30 = vld [vmem:[#allocation6 + $0x3b4] sm:$0xf0] }
 0x138   :  { %1137 = vmatpush.bf16.msrb.mxu2 %v2226_v45  ;;  %1178 = vmatpush.bf16.msra.mxu1 %v2278_v63  ;;  %v2254_v45 = vor.u32 %v2676_v43, %v2251_v44  ;;  %v2701_v43 = vld [vmem:[#allocation6 + $0x464] sm:$0xf0] }
 0x139   :  { %1150 = vmatpush.bf16.msrb.mxu3 %v2290_v32 }
 0x13b   :  { %1163 = vmatpush.bf16.msra.mxu0 %v2230_v46  ;;  %v2193_v46 = vld [vmem:[#allocation6 + $0x330] sm:$0xf] }
 0x13c   :  { %1138 = vmatpush.bf16.msrb.mxu2 %v2218_v53  ;;  %1179 = vmatpush.bf16.msra.mxu1 %v2270_v11  ;;  %v2194_v49 = vor.u32 %v2663_v47, %v2193_v46  ;;  %v2675_v53 = vld [vmem:[#allocation6 + $0x394] sm:$0xf0]  ;;  %v2658_v11 = vld [vmem:[#allocation6 + $0x314] sm:$0xf]  ;;  %v2347_v46 = vld [vmem:[#allocation6 + $0x468] sm:$0xf0] }
 0x13d   :  { %1151 = vmatpush.bf16.msrb.mxu3 %v2282_v40  ;;  %v2677_v40 = vld [vmem:[#allocation6 + $0x3a4] sm:$0xf0]  ;;  %v2242_v54 = vor.u32 %v2675_v53, %v2241_v52  ;;  %v2712_v52 = vld [vmem:[#allocation6 + $0x4c4] sm:$0xf]  ;;  %v2395_v53 = vld [vmem:[#allocation6 + $0x4c8] sm:$0xf0] }
 0x13f   :  { %1164 = vmatpush.bf16.msra.mxu0 %v2222_v58  ;;  %v2185_v58 = vld [vmem:[#allocation6 + $0x320] sm:$0xf] }
 0x140   :  { %1139 = vmatpush.bf16.msrb.mxu2 %v2210_v7  ;;  %1180 = vmatpush.bf16.msra.mxu1 %v2262_v34  ;;  %v2186_v63 = vor.u32 %v2661_v59, %v2185_v58  ;;  %v2238_v7 = vor.u32 %v2672_v4, %v2235_v6  ;;  %v2702_v34 = vld [vmem:[#allocation6 + $0x474] sm:$0xf] }
 0x141   :  { %1152 = vmatpush.bf16.msrb.mxu3 %v2274_v57  ;;  %v2246_v57 = vor.u32 %v2674_v55, %v2243_v56  ;;  %v715_v55 = vld [vmem:[#allocation7 + $0x3] ss:$8 sm:$0x3] }
 0x142   :  { %v718_v58 = vperm.slane %v715_v55, 1 }
 0x143   :  { %1165 = vmatpush.bf16.msra.mxu0 %v2214_v8  ;;  %v2177_v8 = vld [vmem:[#allocation6 + $0x310] sm:$0xf] }
 0x144   :  { %1140 = vmatpush.bf16.msrb.mxu2 %v2202_v38  ;;  %1181 = vmatpush.bf16.msra.mxu1 %v2254_v45  ;;  %v2358_v38 = vor.u32 %v2702_v34, %v2355_v35  ;;  %v2700_v45 = vld [vmem:[#allocation6 + $0x464] sm:$0xf] }
 0x145   :  { %1153 = vmatpush.bf16.msrb.mxu3 %v2266_v9  ;;  %v2659_v9 = vld [vmem:[#allocation6 + $0x314] sm:$0xf0]  ;;  %v2350_v48 = vor.u32 %v2700_v45, %v2347_v46  ;;  %v2708_v34 = vld [vmem:[#allocation6 + $0x4a4] sm:$0xf]  ;;  %v2706_v45 = vld [vmem:[#allocation6 + $0x494] sm:$0xf] }
 0x147   :  { %1166 = vmatpush.bf16.msra.mxu0 %v2206_v41  ;;  %v2403_v41 = vld [vmem:[#allocation6 + $0x4d8] sm:$0xf0] }
 0x148   :  { %1141 = vmatpush.bf16.msrb.mxu2 %v2194_v49  ;;  %1182 = vmatpush.bf16.msra.mxu1 %v2246_v57  ;;  %v2398_v57 = vor.u32 %v2712_v52, %v2395_v53  ;;  %v2315_v53 = vld [vmem:[#allocation6 + $0x428] sm:$0xf0] }
 0x14b   :  { %1167 = vmatpush.bf16.msra.mxu0 %v2198_v51  ;;  %v2713_v51 = vld [vmem:[#allocation6 + $0x4c4] sm:$0xf0] }
 0x14c   :  { %1142 = vmatpush.bf16.msrb.mxu2 %v2186_v63  ;;  %1183 = vmatpush.bf16.msra.mxu1 %v2238_v7  ;;  %v2394_v56 = vor.u32 %v2713_v51, %v2393_v50  ;;  %v2693_v50 = vld [vmem:[#allocation6 + $0x424] sm:$0xf0]  ;;  %v2692_v51 = vld [vmem:[#allocation6 + $0x424] sm:$0xf] }
 0x14f   :  { %1168 = vmatpush.bf16.msra.mxu0 %v2190_v1 }
 0x1ac   :  { %v671_v3 = vpop.f32.mrf.mxu1 }
 0x1b2   :  { %v645_v12 = vpop.f32.mrf.mxu3  ;;  %v658_v13 = vpop.f32.mrf.mxu0 }
 0x1b3   :  { %v659_v14 = vadd.f32 %v658_v13, %v460_v10  ;;  %v2178_v10 = vor.u32 %v2659_v9, %v2177_v8 }
 0x1b4   :  { %v673_v15 = vpop.f32.mrf.mxu1 }
 0x1b5   :  { %v672_v16 = vadd.f32 %v671_v3, %v659_v14  ;;  %v2673_v3 = vld [vmem:[#allocation6 + $0x384] sm:$0xf0]  ;;  %1143 = vmatpush.bf16.msrb.mxu2 %v2178_v10  ;;  %v2169_v14 = vld [vmem:[#allocation6 + $0x300] sm:$0xf] }
 0x1b6   :  { %v2234_v5 = vor.u32 %v2673_v3, %v2233_v2  ;;  %v2657_v15 = vld [vmem:[#allocation6 + $0x304] sm:$0xf0]  ;;  %v717_v2 = vperm.slane %v715_v55, 0  ;;  %v2361_v55 = vld [vmem:[#allocation6 + $0x480] sm:$0xf] }
 0x1b7   :  { %v676_v18 = vmax.f32 %v672_v16, 0.0  ;;  %v2656_v16 = vld [vmem:[#allocation6 + $0x304] sm:$0xf] }
 0x1b8   :  { %v632_v19 = vpop.f32.mrf.mxu2 }
 0x1b9   :  { %v2922_v20 = vadd.f32 %v676_v18, %v2915_v61  ;;  %v633_v21 = vadd.f32 %v632_v19, %v459_v17  ;;  %v2257_v61 = vld [vmem:[#allocation6 + $0x3b0] sm:$0xf]  ;;  %v2170_v17 = vor.u32 %v2657_v15, %v2169_v14  ;;  %v2171_v18 = vld [vmem:[#allocation6 + $0x308] sm:$0xf0]  ;;  %v2699_v14 = vld [vmem:[#allocation6 + $0x454] sm:$0xf0] }
 0x1ba   :  { %v647_v22 = vpop.f32.mrf.mxu3  ;;  %v660_v23 = vpop.f32.mrf.mxu0  ;;  %v2258_v32 = vor.u32 %v2679_v30, %v2257_v61  ;;  %v2174_v19 = vor.u32 %v2656_v16, %v2171_v18  ;;  %v2716_v61 = vld [vmem:[#allocation6 + $0x4e4] sm:$0xf]  ;;  %v2411_v30 = vld [vmem:[#allocation6 + $0x4e8] sm:$0xf0]  ;;  %v2698_v15 = vld [vmem:[#allocation6 + $0x454] sm:$0xf] }
 0x1bb   :  { %v713_v24 = vpack.c.bf16 %v2922_v20, %v2922_v20  ;;  %v646_v25 = vadd.f32 %v645_v12, %v633_v21  ;;  %v2179_v12 = vld [vmem:[#allocation6 + $0x318] sm:$0xf0]  ;;  %1144 = vmatpush.bf16.msrb.mxu2 %v2170_v17  ;;  %v2417_v21 = vld [vmem:[#allocation6 + $0x4f0] sm:$0xf]  ;;  %v2719_v22 = vld [vmem:[#allocation6 + $0x4f4] sm:$0xf0]  ;;  %v2414_v36 = vor.u32 %v2716_v61, %v2411_v30 }
 0x1bc   :  { %1154 = vmatpush.bf16.msrb.mxu3 %v2258_v32  ;;  %v2182_v13 = vor.u32 %v2658_v11, %v2179_v12  ;;  %v2718_v23 = vld [vmem:[#allocation6 + $0x4f4] sm:$0xf]  ;;  %v2339_v17 = vld [vmem:[#allocation6 + $0x458] sm:$0xf0]  ;;  %v2696_v61 = vld [vmem:[#allocation6 + $0x444] sm:$0xf] }
 0x1bd   :  { %v675_v26 = vmax.f32 %v646_v25, 0.0  ;;  %902 = vmatmul.bf16.vlgmr.msra.gmra.mxu3 %v713_v24  ;;  %928 = vmatmul.bf16.vlgmr.msrb.gmra.mxu1 %v713_v24  ;;  %v2418_v24 = vor.u32 %v2719_v22, %v2417_v21  ;;  %v2419_v25 = vld [vmem:[#allocation6 + $0x4f8] sm:$0xf0]  ;;  %v2342_v18 = vor.u32 %v2698_v15, %v2339_v17  ;;  %v2711_v21 = vld [vmem:[#allocation6 + $0x4b4] sm:$0xf0] }
 0x1be   :  { %1169 = vmatpush.bf16.msra.mxu0 %v2182_v13  ;;  %v2337_v13 = vld [vmem:[#allocation6 + $0x450] sm:$0xf]  ;;  %v2710_v22 = vld [vmem:[#allocation6 + $0x4b4] sm:$0xf]  ;;  %v2331_v30 = vld [vmem:[#allocation6 + $0x448] sm:$0xf0] }
 0x1bf   :  { %v2927_v27 = vadd.f32 %v675_v26, %v2913_v60  ;;  %v2249_v60 = vld [vmem:[#allocation6 + $0x3a0] sm:$0xf]  ;;  %v2338_v16 = vor.u32 %v2699_v14, %v2337_v13  ;;  %v2334_v31 = vor.u32 %v2696_v61, %v2331_v30  ;;  %v2750_v13 = vld [vmem:[#allocation6 + $0x5f4] sm:$0xf]  ;;  %v2547_v15 = vld [vmem:[#allocation6 + $0x5f8] sm:$0xf0] }
 0x1c0   :  { %v634_v28 = vpop.f32.mrf.mxu2  ;;  %v2250_v42 = vor.u32 %v2677_v40, %v2249_v60  ;;  %v2409_v26 = vld [vmem:[#allocation6 + $0x4e0] sm:$0xf]  ;;  %v2715_v60 = vld [vmem:[#allocation6 + $0x4d4] sm:$0xf0]  ;;  %v2714_v40 = vld [vmem:[#allocation6 + $0x4d4] sm:$0xf] }
 0x1c1   :  { %v712_v29 = vpack.c.bf16 %v2927_v27, %v2927_v27  ;;  %v2717_v28 = vld [vmem:[#allocation6 + $0x4e4] sm:$0xf0]  ;;  %v2402_v47 = vor.u32 %v2715_v60, %v2401_v39  ;;  %v2406_v49 = vor.u32 %v2714_v40, %v2403_v41  ;;  %v2695_v39 = vld [vmem:[#allocation6 + $0x434] sm:$0xf0]  ;;  %v2694_v40 = vld [vmem:[#allocation6 + $0x434] sm:$0xf] }
 0x1c2   :  { %1155 = vmatpush.bf16.msrb.mxu3 %v2250_v42  ;;  %1170 = vmatpush.bf16.msra.mxu0 %v2174_v19  ;;  %v2410_v32 = vor.u32 %v2717_v28, %v2409_v26  ;;  %v2345_v42 = vld [vmem:[#allocation6 + $0x460] sm:$0xf]  ;;  %v2385_v19 = vld [vmem:[#allocation6 + $0x4b0] sm:$0xf]  ;;  %v2697_v26 = vld [vmem:[#allocation6 + $0x444] sm:$0xf0] }
 0x1c3   :  { %889 = vmatmul.bf16.vlgmr.msra.gmra.mxu2 %v712_v29  ;;  %915 = vmatmul.bf16.vlgmr.msrb.gmra.mxu0 %v712_v29  ;;  %v2422_v29 = vor.u32 %v2718_v23, %v2419_v25  ;;  %v2346_v44 = vor.u32 %v2701_v43, %v2345_v42  ;;  %v2386_v23 = vor.u32 %v2711_v21, %v2385_v19  ;;  %v2329_v25 = vld [vmem:[#allocation6 + $0x440] sm:$0xf]  ;;  %v2323_v41 = vld [vmem:[#allocation6 + $0x438] sm:$0xf0]  ;;  %v2369_v43 = vld [vmem:[#allocation6 + $0x490] sm:$0xf] }
 0x1c4   :  { %1395 = vmatpush.bf16.msra.mxu2 %v2354_v37  ;;  %v2326_v42 = vor.u32 %v2694_v40, %v2323_v41  ;;  %v2749_v17 = vld [vmem:[#allocation6 + $0x5e4] sm:$0xf0]  ;;  %v2748_v19 = vld [vmem:[#allocation6 + $0x5e4] sm:$0xf]  ;;  %v2539_v21 = vld [vmem:[#allocation6 + $0x5e8] sm:$0xf0] }
 0x1c5   :  { %1434 = vmatpush.bf16.msrb.mxu1 %v2422_v29  ;;  %v2330_v29 = vor.u32 %v2697_v26, %v2329_v25  ;;  %v2734_v25 = vld [vmem:[#allocation6 + $0x574] sm:$0xf]  ;;  %v2483_v26 = vld [vmem:[#allocation6 + $0x578] sm:$0xf0]  ;;  %v2529_v30 = vld [vmem:[#allocation6 + $0x5d0] sm:$0xf] }
 0x1c6   :  { %1156 = vmatpush.bf16.msrb.mxu3 %v2242_v54  ;;  %1421 = vmatpush.bf16.msrb.mxu0 %v2358_v38  ;;  %v2321_v38 = vld [vmem:[#allocation6 + $0x430] sm:$0xf]  ;;  %v2486_v61 = vor.u32 %v2734_v25, %v2483_v26  ;;  %v2521_v41 = vld [vmem:[#allocation6 + $0x5c0] sm:$0xf]  ;;  %v2740_v26 = vld [vmem:[#allocation6 + $0x5a4] sm:$0xf] }
 0x1c7   :  { %v2322_v60 = vor.u32 %v2695_v39, %v2321_v38  ;;  %v2475_v38 = vld [vmem:[#allocation6 + $0x568] sm:$0xf0] }
 0x1c8   :  { %1396 = vmatpush.bf16.msra.mxu2 %v2346_v44  ;;  %v2707_v44 = vld [vmem:[#allocation6 + $0x494] sm:$0xf0]  ;;  %v971_v39 = vld [vmem:[#allocation7 + $0x4] ss:$8 sm:$0x3] }
 0x1c9   :  { %1435 = vmatpush.bf16.msrb.mxu1 %v2414_v36  ;;  %v2379_v36 = vld [vmem:[#allocation6 + $0x4a8] sm:$0xf0]  ;;  %v2370_v46 = vor.u32 %v2707_v44, %v2369_v43  ;;  %v2465_v44 = vld [vmem:[#allocation6 + $0x550] sm:$0xf] }
 0x1ca   :  { %1157 = vmatpush.bf16.msrb.mxu3 %v2234_v5  ;;  %1422 = vmatpush.bf16.msrb.mxu0 %v2350_v48  ;;  %v2382_v37 = vor.u32 %v2708_v34, %v2379_v36  ;;  %v2473_v34 = vld [vmem:[#allocation6 + $0x560] sm:$0xf] }
 0x1cc   :  { %1397 = vmatpush.bf16.msra.mxu2 %v2338_v16  ;;  %v2537_v16 = vld [vmem:[#allocation6 + $0x5e0] sm:$0xf] }
 0x1cd   :  { %1436 = vmatpush.bf16.msrb.mxu1 %v2406_v49  ;;  %v2313_v49 = vld [vmem:[#allocation6 + $0x420] sm:$0xf] }
 0x1ce   :  { %1408 = vmatpush.bf16.msra.mxu3 %v2418_v24  ;;  %v2387_v24 = vld [vmem:[#allocation6 + $0x4b8] sm:$0xf0]  ;;  %1423 = vmatpush.bf16.msrb.mxu0 %v2342_v18  ;;  %v2314_v52 = vor.u32 %v2693_v50, %v2313_v49  ;;  %v2550_v18 = vor.u32 %v2750_v13, %v2547_v15  ;;  %v2523_v49 = vld [vmem:[#allocation6 + $0x5c8] sm:$0xf0]  ;;  %v2742_v13 = vld [vmem:[#allocation6 + $0x5b4] sm:$0xf] }
 0x1cf   :  { %v2390_v28 = vor.u32 %v2710_v22, %v2387_v24  ;;  %v2481_v22 = vld [vmem:[#allocation6 + $0x570] sm:$0xf]  ;;  %v2735_v24 = vld [vmem:[#allocation6 + $0x574] sm:$0xf0]  ;;  %v2467_v50 = vld [vmem:[#allocation6 + $0x558] sm:$0xf0] }
 0x1d0   :  { %1398 = vmatpush.bf16.msra.mxu2 %v2330_v29  ;;  %v2482_v29 = vor.u32 %v2735_v24, %v2481_v22  ;;  %v2515_v15 = vld [vmem:[#allocation6 + $0x5b8] sm:$0xf0]  ;;  %v2459_v22 = vld [vmem:[#allocation6 + $0x548] sm:$0xf0] }
 0x1d1   :  { %1437 = vmatpush.bf16.msrb.mxu1 %v2398_v57 }
 0x1d2   :  { %1409 = vmatpush.bf16.msra.mxu3 %v2410_v32  ;;  %v2377_v32 = vld [vmem:[#allocation6 + $0x4a0] sm:$0xf]  ;;  %1424 = vmatpush.bf16.msrb.mxu0 %v2334_v31  ;;  %v2747_v31 = vld [vmem:[#allocation6 + $0x5d4] sm:$0xf0] }
 0x1d3   :  { %v2378_v35 = vor.u32 %v2709_v33, %v2377_v32  ;;  %v2746_v32 = vld [vmem:[#allocation6 + $0x5d4] sm:$0xf]  ;;  %v2531_v33 = vld [vmem:[#allocation6 + $0x5d8] sm:$0xf0] }
 0x1d4   :  { %1399 = vmatpush.bf16.msra.mxu2 %v2322_v60  ;;  %v2530_v60 = vor.u32 %v2747_v31, %v2529_v30  ;;  %v2534_v43 = vor.u32 %v2746_v32, %v2531_v33  ;;  %v2727_v30 = vld [vmem:[#allocation6 + $0x534] sm:$0xf0]  ;;  %v2726_v31 = vld [vmem:[#allocation6 + $0x534] sm:$0xf]  ;;  %v2451_v33 = vld [vmem:[#allocation6 + $0x538] sm:$0xf0] }
 0x1d5   :  { %1438 = vmatpush.bf16.msrb.mxu1 %v2390_v28  ;;  %v2542_v28 = vor.u32 %v2748_v19, %v2539_v21  ;;  %v2728_v19 = vld [vmem:[#allocation6 + $0x544] sm:$0xf] }
 0x1d6   :  { %1410 = vmatpush.bf16.msra.mxu3 %v2402_v47  ;;  %v2371_v47 = vld [vmem:[#allocation6 + $0x498] sm:$0xf0]  ;;  %1425 = vmatpush.bf16.msrb.mxu0 %v2326_v42  ;;  %v2745_v42 = vld [vmem:[#allocation6 + $0x5c4] sm:$0xf0]  ;;  %v2462_v24 = vor.u32 %v2728_v19, %v2459_v22 }
 0x1d7   :  { %v2374_v48 = vor.u32 %v2706_v45, %v2371_v47  ;;  %v2731_v45 = vld [vmem:[#allocation6 + $0x554] sm:$0xf0] }
 0x1d8   :  { %1400 = vmatpush.bf16.msra.mxu2 %v2314_v52 }
 0x1d9   :  { %1439 = vmatpush.bf16.msrb.mxu1 %v2382_v37  ;;  %v2732_v37 = vld [vmem:[#allocation6 + $0x564] sm:$0xf] }
 0x1da   :  { %1411 = vmatpush.bf16.msra.mxu3 %v2394_v56  ;;  %v2705_v56 = vld [vmem:[#allocation6 + $0x484] sm:$0xf0]  ;;  %v2478_v40 = vor.u32 %v2732_v37, %v2475_v38  ;;  %v2738_v38 = vld [vmem:[#allocation6 + $0x594] sm:$0xf] }
 0x1db   :  { %v2362_v57 = vor.u32 %v2705_v56, %v2361_v55 }
 0x1dd   :  { %1440 = vmatpush.bf16.msrb.mxu1 %v2374_v48  ;;  %v2744_v48 = vld [vmem:[#allocation6 + $0x5c4] sm:$0xf] }
 0x1de   :  { %1412 = vmatpush.bf16.msra.mxu3 %v2386_v23  ;;  %v2538_v23 = vor.u32 %v2749_v17, %v2537_v16  ;;  %v2526_v55 = vor.u32 %v2744_v48, %v2523_v49  ;;  %v2518_v16 = vor.u32 %v2742_v13, %v2515_v15  ;;  %v2457_v17 = vld [vmem:[#allocation6 + $0x540] sm:$0xf]  ;;  %v2736_v48 = vld [vmem:[#allocation6 + $0x584] sm:$0xf] }
 0x1e2   :  { %1413 = vmatpush.bf16.msra.mxu3 %v2378_v35  ;;  %v2733_v35 = vld [vmem:[#allocation6 + $0x564] sm:$0xf0] }
 0x1e3   :  { %v2474_v36 = vor.u32 %v2733_v35, %v2473_v34  ;;  %v2454_v34 = vor.u32 %v2726_v31, %v2451_v33  ;;  %v2497_v35 = vld [vmem:[#allocation6 + $0x590] sm:$0xf] }
 0x1e6   :  { %1414 = vmatpush.bf16.msra.mxu3 %v2370_v46  ;;  %v2730_v46 = vld [vmem:[#allocation6 + $0x554] sm:$0xf] }
 0x1e7   :  { %v2470_v52 = vor.u32 %v2730_v46, %v2467_v50  ;;  %v2489_v46 = vld [vmem:[#allocation6 + $0x580] sm:$0xf]  ;;  %v2491_v50 = vld [vmem:[#allocation6 + $0x588] sm:$0xf0] }
 0x1ea   :  { %1415 = vmatpush.bf16.msra.mxu3 %v2362_v57 }
 0x23a   :  { %v929_v54 = vpop.f32.mrf.mxu1 }
 0x240   :  { %v903_v59 = vpop.f32.mrf.mxu3  ;;  %v916_v62 = vpop.f32.mrf.mxu0 }
 0x241   :  { %v917_v63 = vadd.f32 %v916_v62, %v718_v58  ;;  %v2704_v58 = vld [vmem:[#allocation6 + $0x484] sm:$0xf] }
 0x242   :  { %v931_v0 = vpop.f32.mrf.mxu1 }
 0x243   :  { %v930_v1 = vadd.f32 %v929_v54, %v917_v63  ;;  %v2318_v54 = vor.u32 %v2692_v51, %v2315_v53  ;;  %v2305_v63 = vld [vmem:[#allocation6 + $0x410] sm:$0xf]  ;;  %v2691_v0 = vld [vmem:[#allocation6 + $0x414] sm:$0xf0]  ;;  %v2466_v51 = vor.u32 %v2731_v45, %v2465_v44  ;;  %v2522_v53 = vor.u32 %v2745_v42, %v2521_v41  ;;  %v2725_v41 = vld [vmem:[#allocation6 + $0x524] sm:$0xf0] }
 0x244   :  { %v2724_v42 = vld [vmem:[#allocation6 + $0x524] sm:$0xf]  ;;  %v2443_v44 = vld [vmem:[#allocation6 + $0x528] sm:$0xf0] }
 0x245   :  { %v934_v3 = vmax.f32 %v930_v1, 0.0  ;;  %1426 = vmatpush.bf16.msrb.mxu0 %v2318_v54  ;;  %v2690_v1 = vld [vmem:[#allocation6 + $0x414] sm:$0xf]  ;;  %v974_v54 = vperm.slane %v971_v39, 1  ;;  %v2446_v45 = vor.u32 %v2724_v42, %v2443_v44 }
 0x246   :  { %v890_v4 = vpop.f32.mrf.mxu2 }
 0x247   :  { %v969_v5 = vpack.c.bf16 %v934_v3, %v934_v3  ;;  %v891_v6 = vadd.f32 %v890_v4, %v717_v2  ;;  %v2306_v2 = vor.u32 %v2691_v0, %v2305_v63  ;;  %v2307_v3 = vld [vmem:[#allocation6 + $0x418] sm:$0xf0]  ;;  %v973_v63 = vperm.slane %v971_v39, 0 }
 0x248   :  { %v905_v7 = vpop.f32.mrf.mxu3  ;;  %v918_v8 = vpop.f32.mrf.mxu0  ;;  %v2310_v4 = vor.u32 %v2690_v1, %v2307_v3  ;;  %v2499_v39 = vld [vmem:[#allocation6 + $0x598] sm:$0xf0] }
 0x249   :  { %v904_v9 = vadd.f32 %v903_v59, %v891_v6  ;;  %1158 = vmatmul.bf16.vlgmr.msrb.gmra.mxu3 %v969_v5  ;;  %1184 = vmatmul.bf16.vlgmr.msra.gmra.mxu1 %v969_v5  ;;  %v2363_v59 = vld [vmem:[#allocation6 + $0x488] sm:$0xf0]  ;;  %v2297_v5 = vld [vmem:[#allocation6 + $0x400] sm:$0xf]  ;;  %v2689_v6 = vld [vmem:[#allocation6 + $0x404] sm:$0xf0] }
 0x24a   :  { %v2366_v62 = vor.u32 %v2704_v58, %v2363_v59  ;;  %1401 = vmatpush.bf16.msra.mxu2 %v2306_v2  ;;  %1427 = vmatpush.bf16.msrb.mxu0 %v2310_v4  ;;  %v2688_v7 = vld [vmem:[#allocation6 + $0x404] sm:$0xf]  ;;  %v2298_v8 = vor.u32 %v2689_v6, %v2297_v5 }
 0x24b   :  { %v933_v10 = vmax.f32 %v904_v9, 0.0  ;;  %v2299_v9 = vld [vmem:[#allocation6 + $0x408] sm:$0xf0] }
 0x24c   :  { %1441 = vmatpush.bf16.msrb.mxu1 %v2366_v62 }
 0x24d   :  { %v968_v11 = vpack.c.bf16 %v933_v10, %v933_v10  ;;  %v2302_v10 = vor.u32 %v2688_v7, %v2299_v9 }
 0x24e   :  { %v892_v12 = vpop.f32.mrf.mxu2  ;;  %1402 = vmatpush.bf16.msra.mxu2 %v2298_v8 }
 0x24f   :  { %1145 = vmatmul.bf16.vlgmr.msrb.gmra.mxu2 %v968_v11  ;;  %1171 = vmatmul.bf16.vlgmr.msra.gmra.mxu0 %v968_v11  ;;  %v2545_v11 = vld [vmem:[#allocation6 + $0x5f0] sm:$0xf]  ;;  %v2751_v12 = vld [vmem:[#allocation6 + $0x5f4] sm:$0xf0] }
 0x250   :  { %1428 = vmatpush.bf16.msrb.mxu0 %v2302_v10  ;;  %v2546_v14 = vor.u32 %v2751_v12, %v2545_v11  ;;  %1690 = vmatpush.bf16.msra.mxu1 %v2550_v18  ;;  %v2743_v12 = vld [vmem:[#allocation6 + $0x5b4] sm:$0xf0]  ;;  %v2729_v18 = vld [vmem:[#allocation6 + $0x544] sm:$0xf0] }
 0x251   :  { %v2458_v21 = vor.u32 %v2729_v18, %v2457_v17 }
 0x252   :  { %1664 = vmatpush.bf16.msrb.mxu3 %v2546_v14  ;;  %1651 = vmatpush.bf16.msrb.mxu2 %v2482_v29 }
 0x254   :  { %1677 = vmatpush.bf16.msra.mxu0 %v2486_v61  ;;  %1691 = vmatpush.bf16.msra.mxu1 %v2542_v28  ;;  %v2507_v28 = vld [vmem:[#allocation6 + $0x5a8] sm:$0xf0]  ;;  %v2449_v61 = vld [vmem:[#allocation6 + $0x530] sm:$0xf] }
 0x255   :  { %v2510_v29 = vor.u32 %v2740_v26, %v2507_v28  ;;  %v2450_v32 = vor.u32 %v2727_v30, %v2449_v61 }
 0x256   :  { %1665 = vmatpush.bf16.msrb.mxu3 %v2538_v23  ;;  %1652 = vmatpush.bf16.msrb.mxu2 %v2474_v36  ;;  %v2741_v23 = vld [vmem:[#allocation6 + $0x5a4] sm:$0xf0]  ;;  %v2739_v36 = vld [vmem:[#allocation6 + $0x594] sm:$0xf0] }
 0x257   :  { %v2498_v37 = vor.u32 %v2739_v36, %v2497_v35  ;;  %v1708_v36 = vld [vmem:[#allocation7 + $0x15] ss:$8 sm:$0x3] }
 0x258   :  { %1678 = vmatpush.bf16.msra.mxu0 %v2478_v40  ;;  %1692 = vmatpush.bf16.msra.mxu1 %v2534_v43  ;;  %v2441_v40 = vld [vmem:[#allocation6 + $0x520] sm:$0xf] }
 0x259   :  { %v2442_v43 = vor.u32 %v2725_v41, %v2441_v40  ;;  %v1712_v40 = vperm.slane %v1708_v36, 1 }
 0x25a   :  { %1666 = vmatpush.bf16.msrb.mxu3 %v2530_v60  ;;  %1653 = vmatpush.bf16.msrb.mxu2 %v2466_v51  ;;  %v2502_v60 = vor.u32 %v2738_v38, %v2499_v39  ;;  %v2494_v51 = vor.u32 %v2736_v48, %v2491_v50 }
 0x25c   :  { %1679 = vmatpush.bf16.msra.mxu0 %v2470_v52  ;;  %1693 = vmatpush.bf16.msra.mxu1 %v2526_v55  ;;  %v2433_v52 = vld [vmem:[#allocation6 + $0x510] sm:$0xf]  ;;  %v2722_v55 = vld [vmem:[#allocation6 + $0x514] sm:$0xf] }
 0x25e   :  { %1667 = vmatpush.bf16.msrb.mxu3 %v2522_v53  ;;  %1654 = vmatpush.bf16.msrb.mxu2 %v2458_v21  ;;  %v2723_v53 = vld [vmem:[#allocation6 + $0x514] sm:$0xf0] }
 0x260   :  { %1694 = vmatpush.bf16.msra.mxu1 %v2518_v16  ;;  %1680 = vmatpush.bf16.msra.mxu0 %v2462_v24 }
 0x262   :  { %1655 = vmatpush.bf16.msrb.mxu2 %v2450_v32 }
 0x264   :  { %1695 = vmatpush.bf16.msra.mxu1 %v2510_v29  ;;  %1681 = vmatpush.bf16.msra.mxu0 %v2454_v34 }
 0x266   :  { %1656 = vmatpush.bf16.msrb.mxu2 %v2442_v43 }
 0x268   :  { %1696 = vmatpush.bf16.msra.mxu1 %v2502_v60  ;;  %1682 = vmatpush.bf16.msra.mxu0 %v2446_v45  ;;  %v1711_v60 = vperm.slane %v1708_v36, 0 }
 0x26c   :  { %1697 = vmatpush.bf16.msra.mxu1 %v2494_v51 }
 0x2c6   :  { %v1185_v47 = vpop.f32.mrf.mxu1 }
 0x2cc   :  { %v1159_v56 = vpop.f32.mrf.mxu3  ;;  %v1172_v57 = vpop.f32.mrf.mxu0 }
 0x2cd   :  { %v1173_v58 = vadd.f32 %v1172_v57, %v974_v54  ;;  %v2434_v54 = vor.u32 %v2723_v53, %v2433_v52 }
 0x2ce   :  { %v1187_v59 = vpop.f32.mrf.mxu1 }
 0x2cf   :  { %v1186_v62 = vadd.f32 %v1185_v47, %v1173_v58  ;;  %v2737_v47 = vld [vmem:[#allocation6 + $0x584] sm:$0xf0]  ;;  %1657 = vmatpush.bf16.msrb.mxu2 %v2434_v54  ;;  %v2425_v58 = vld [vmem:[#allocation6 + $0x500] sm:$0xf] }
 0x2d0   :  { %v2490_v49 = vor.u32 %v2737_v47, %v2489_v46  ;;  %v2721_v59 = vld [vmem:[#allocation6 + $0x504] sm:$0xf0]  ;;  %v1709_v46 = vld [vmem:[#allocation7 + $0x16] ss:$0 sm:$0xff] }
 0x2d1   :  { %v1190_v0 = vmax.f32 %v1186_v62, 0.0  ;;  %v2720_v62 = vld [vmem:[#allocation6 + $0x504] sm:$0xf] }
 0x2d2   :  { %v1146_v1 = vpop.f32.mrf.mxu2 }
 0x2d3   :  { %v2932_v2 = vadd.f32 %v1190_v0, %v2922_v20  ;;  %v1147_v3 = vadd.f32 %v1146_v1, %v973_v63  ;;  %v2513_v20 = vld [vmem:[#allocation6 + $0x5b0] sm:$0xf]  ;;  %v2426_v63 = vor.u32 %v2721_v59, %v2425_v58  ;;  %v2427_v0 = vld [vmem:[#allocation6 + $0x508] sm:$0xf0] }
 0x2d4   :  { %v1161_v4 = vpop.f32.mrf.mxu3  ;;  %v1174_v5 = vpop.f32.mrf.mxu0  ;;  %v2514_v14 = vor.u32 %v2743_v12, %v2513_v20  ;;  %v2430_v1 = vor.u32 %v2720_v62, %v2427_v0 }
 0x2d5   :  { %v1227_v6 = vpack.c.bf16 %v2932_v2, %v2932_v2  ;;  %v1160_v7 = vadd.f32 %v1159_v56, %v1147_v3  ;;  %v2435_v56 = vld [vmem:[#allocation6 + $0x518] sm:$0xf0]  ;;  %1658 = vmatpush.bf16.msrb.mxu2 %v2426_v63  ;;  %v1229_v4 = vld [vmem:[#allocation7 + $0x5] ss:$8 sm:$0x3] }
 0x2d6   :  { %1668 = vmatpush.bf16.msrb.mxu3 %v2514_v14  ;;  %v2438_v57 = vor.u32 %v2722_v55, %v2435_v56  ;;  %v1232_v5 = vperm.slane %v1229_v4, 1  ;;  %v1231_v20 = vperm.slane %v1229_v4, 0 }
 0x2d7   :  { %v1189_v8 = vmax.f32 %v1160_v7, 0.0  ;;  %1416 = vmatmul.bf16.vlgmr.msra.gmra.mxu3 %v1227_v6  ;;  %1442 = vmatmul.bf16.vlgmr.msrb.gmra.mxu1 %v1227_v6 }
 0x2d8   :  { %1683 = vmatpush.bf16.msra.mxu0 %v2438_v57 }
 0x2d9   :  { %v2937_v9 = vadd.f32 %v1189_v8, %v2927_v27  ;;  %v2505_v27 = vld [vmem:[#allocation6 + $0x5a0] sm:$0xf] }
 0x2da   :  { %v1148_v10 = vpop.f32.mrf.mxu2  ;;  %v2506_v25 = vor.u32 %v2741_v23, %v2505_v27  ;;  %v1485_v23 = vld [vmem:[#allocation7 + $0x6] ss:$8 sm:$0x3] }
 0x2db   :  { %v1226_v11 = vpack.c.bf16 %v2937_v9, %v2937_v9  ;;  %v1488_v24 = vperm.slane %v1485_v23, 1  ;;  %v1487_v30 = vperm.slane %v1485_v23, 0 }
 0x2dc   :  { %1669 = vmatpush.bf16.msrb.mxu3 %v2506_v25  ;;  %1684 = vmatpush.bf16.msra.mxu0 %v2430_v1 }
 0x2dd   :  { %1403 = vmatmul.bf16.vlgmr.msra.gmra.mxu2 %v1226_v11  ;;  %1429 = vmatmul.bf16.vlgmr.msrb.gmra.mxu0 %v1226_v11 }
 0x2e0   :  { %1670 = vmatpush.bf16.msrb.mxu3 %v2498_v37 }
 0x2e4   :  { %1671 = vmatpush.bf16.msrb.mxu3 %v2490_v49 }
 0x354   :  { %v1443_v3 = vpop.f32.mrf.mxu1 }
 0x35a   :  { %v1417_v6 = vpop.f32.mrf.mxu3  ;;  %v1430_v7 = vpop.f32.mrf.mxu0 }
 0x35b   :  { %v1431_v8 = vadd.f32 %v1430_v7, %v1232_v5 }
 0x35c   :  { %v1445_v10 = vpop.f32.mrf.mxu1 }
 0x35d   :  { %v1444_v11 = vadd.f32 %v1443_v3, %v1431_v8 }
 0x35f   :  { %v1448_v12 = vmax.f32 %v1444_v11, 0.0 }
 0x360   :  { %v1404_v13 = vpop.f32.mrf.mxu2 }
 0x361   :  { %v1483_v14 = vpack.c.bf16 %v1448_v12, %v1448_v12  ;;  %v1405_v15 = vadd.f32 %v1404_v13, %v1231_v20 }
 0x362   :  { %v1419_v16 = vpop.f32.mrf.mxu3  ;;  %v1432_v17 = vpop.f32.mrf.mxu0 }
 0x363   :  { %v1418_v18 = vadd.f32 %v1417_v6, %v1405_v15  ;;  %1672 = vmatmul.bf16.vlgmr.msrb.gmra.mxu3 %v1483_v14  ;;  %1698 = vmatmul.bf16.vlgmr.msra.gmra.mxu1 %v1483_v14 }
 0x365   :  { %v1447_v19 = vmax.f32 %v1418_v18, 0.0 }
 0x367   :  { %v1482_v21 = vpack.c.bf16 %v1447_v19, %v1447_v19 }
 0x368   :  { %v1406_v22 = vpop.f32.mrf.mxu2 }
 0x369   :  { %1659 = vmatmul.bf16.vlgmr.msrb.gmra.mxu2 %v1482_v21  ;;  %1685 = vmatmul.bf16.vlgmr.msra.gmra.mxu0 %v1482_v21 }
 0x3e0   :  { %v1699_v27 = vpop.f32.mrf.mxu1 }
 0x3e6   :  { %v1673_v25 = vpop.f32.mrf.mxu3  ;;  %v1686_v26 = vpop.f32.mrf.mxu0 }
 0x3e7   :  { %v1687_v28 = vadd.f32 %v1686_v26, %v1488_v24 }
 0x3e8   :  { %v1701_v29 = vpop.f32.mrf.mxu1 }
 0x3e9   :  { %v1700_v61 = vadd.f32 %v1699_v27, %v1687_v28 }
 0x3eb   :  { %v1704_v32 = vmax.f32 %v1700_v61, 0.0 }
 0x3ec   :  { %v1660_v31 = vpop.f32.mrf.mxu2 }
 0x3ed   :  { %v1661_v33 = vadd.f32 %v1660_v31, %v1487_v30  ;;  %v1706_v39 = vadd.f32 %v1704_v32, %v2932_v2 }
 0x3ee   :  { %v1675_v34 = vpop.f32.mrf.mxu3  ;;  %v1688_v35 = vpop.f32.mrf.mxu0 }
 0x3ef   :  { %v1674_v37 = vadd.f32 %v1673_v25, %v1661_v33  ;;  %v1716_v44 = vmul.f32 %v1712_v40, %v1706_v39 }
 0x3f1   :  { %v1703_v38 = vmax.f32 %v1674_v37, 0.0 }
 0x3f3   :  { %v1705_v41 = vadd.f32 %v1703_v38, %v2937_v9 }
 0x3f4   :  { %v1662_v42 = vpop.f32.mrf.mxu2 }
 0x3f5   :  { %v1715_v43 = vmul.f32 %v1711_v60, %v1705_v41 }
 0x3f7   :  { %v1717_v45 = vadd.f32 %v1716_v44, %v1715_v43 }
 0x3f9   :  { %1718 = vadd.xlane.f32.xlu0 %v1717_v45 }
 0x46c   :  { %v1719_v47 = vpop.xlane.xlu0 %1718 }
 0x46d   :  { %v1720_v48 = vadd.f32 %v1719_v47, %v1709_v46 }
 0x46f   :  { %v2551_v49 = vmul.f32 -1.442695, %v1720_v48 }
 0x471   :  { %2760 = vpow2.f32 %v2551_v49 }
 0x477   :  { %v2761_v50 = vpop.eup %2760 }
 0x478   :  { %v1724_v51 = vadd.f32 1.0, %v2761_v50 }
 0x47a   :  { %2762 = vrcp.f32 %v1724_v51  ;;  %v1736_v54 = vand.u32 2147483648, %v1724_v51  ;;  %v1734_v9 = vand.u32 2147483647, %v1724_v51  ;;  %vm1730_vm2 = vweird.f32 %v1724_v51 }
 0x47c   :  { %v1737_v57 = vor.u32 1.1754944e-38, %v1736_v54  ;;  %vm1735_vm5 = vcmp.eq.f32.partialorder %v1734_v9, 8.507059e+37 }
 0x480   :  { %v2763_v52 = vpop.eup %2762 }
 0x481   :  { %v1726_v53 = vmul.f32 %v2763_v52, %v1724_v51  ;;  %vm1731_vm1 = vweird.f32 %v2763_v52 }
 0x482   :  { %vm1732_vm3 = vmor %vm1730_vm2, %vm1731_vm1 }
 0x483   :  { %v1727_v2 = vsub.f32 1.0, %v1726_v53 }
 0x485   :  { %v1728_v55 = vmul.f32 %v2763_v52, %v1727_v2 }
 0x487   :  { %v1729_v56 = vadd.f32 %v2763_v52, %v1728_v55 }
 0x489   :  { %v1733_v58 = vsel %vm1732_vm3, %v2763_v52, %v1729_v56 }
 0x48a   :  { %v1738_v59 = vsel %vm1735_vm5, %v1737_v57, %v1733_v58 }
 0x48b   :  { %1741 = vst.msk [vmem:[%s2950_s4] sm:$0xff] %vm1740_vm4, %v1738_v59 }
 0x48c   :  { %1746 = vsyncpa [#allocation3], 1 }
 0x48d   :  { %1747 = vsyncpa [#allocation5], 1 }
 0x48e   :  { %1748 = vsyncpa [#allocation8], 1 }

</bundles_post_ra>
